<compile_context>
chip_gen: v7x
topology: tpu7x:2x2x1
jax: 0.10.0
libtpu: 0.0.40
codegen_flags: <defaults>
</compile_context>

<pallas_src>
import functools

import jax
import jax.numpy as jnp
import numpy as np
from jax.experimental import pallas as pl
from jax.experimental.pallas import tpu as pltpu

EPS = 1e-5            # BatchNorm1d default eps
_LANE_CHUNK = 256     # lanes per in-kernel sort pass (2 f32 vregs per row)
_MAX_CHUNKS = 8       # cap on the static chunk unroll inside one grid step


# ---------------------------------------------------------------------------
# Comparator networks (built host-side at trace time; verified by 0-1 rule).
# ---------------------------------------------------------------------------
@functools.lru_cache(maxsize=None)
def _sort_network(n):
    """Batcher merge-exchange sorting network (Knuth 5.2.2M); any n."""
    if n < 2:
        return ()
    pairs = []
    t = (n - 1).bit_length()
    p = 1 << (t - 1)
    while p > 0:
        q, r, d = 1 << (t - 1), 0, p
        while True:
            for i in range(n - d):
                if (i & p) == r:
                    pairs.append((i, i + d))
            if q == p:
                break
            d, q, r = q - p, q >> 1, p
        p >>= 1
    _verify_sort_network(pairs, n)
    return tuple(pairs)


def _verify_sort_network(pairs, n):
    # 0-1 principle: exhaustive (a proof) for n <= 16, random spot-check above.
    if n <= 16:
        idx = np.arange(1 << n, dtype=np.uint32)[:, None]
        m = ((idx >> np.arange(n, dtype=np.uint32)[None, :]) & 1).astype(np.float32)
    else:
        m = (np.random.RandomState(0).rand(4096, n) < 0.5).astype(np.float32)
    ref = np.sort(m, axis=1)
    for i, j in pairs:
        lo = np.minimum(m[:, i], m[:, j])
        hi = np.maximum(m[:, i], m[:, j])
        m[:, i], m[:, j] = lo, hi
    assert np.array_equal(m, ref), "sorting network self-check failed"


@functools.lru_cache(maxsize=None)
def _mad_select_ops(n, k):
    """Ops (i, j, emit_min, emit_max) placing the k-th smallest of a V-shaped
    (non-increasing then non-decreasing, minimum at index k) sequence at index
    k.  Power-of-two n: bitonic merge; otherwise full sort network.  The net is
    backward-sliced to output k and one-sided where only min or max is needed.
    """
    if n < 2:
        return ()
    if n & (n - 1) == 0:
        pairs = []
        d = n // 2
        while d >= 1:
            pairs.extend((i, i + d) for i in range(n) if i % (2 * d) < d)
            d //= 2
    else:
        pairs = list(_sort_network(n))
    needed = {k}
    kept = []
    for i, j in reversed(pairs):
        emit_min, emit_max = i in needed, j in needed
        if emit_min or emit_max:
            kept.append((i, j, emit_min, emit_max))
            needed.update((i, j))
    ops = tuple(reversed(kept))
    _verify_mad_ops(ops, n, k)
    return ops


def _verify_mad_ops(ops, n, k):
    # Exhaustive 0-1 check over every V-shaped (min at index k) threshold image.
    rows = [[1.0] * a + [0.0] * (n - a - c) + [1.0] * c
            for a in range(k + 1) for c in range(n - k)]
    m = np.array(rows, dtype=np.float32)
    ref = np.sort(m, axis=1)[:, k]
    for i, j, emit_min, emit_max in ops:
        lo = np.minimum(m[:, i], m[:, j])
        hi = np.maximum(m[:, i], m[:, j])
        if emit_min:
            m[:, i] = lo
        if emit_max:
            m[:, j] = hi
    assert np.array_equal(m[:, k], ref), "median-selection network self-check failed"


# ---------------------------------------------------------------------------
# Kernel
# ---------------------------------------------------------------------------
def shrinkage_kernel(x_ref, w_ref, b_ref, o_ref):
    # x_ref / o_ref: (L, C, TB) -- batch on lanes (dense), channels on sublanes.
    # w_ref: (2, C, C)  [w1 with BN folded, w2];  b_ref: (2, C, 1)  [b1', b2].
    L, C, TB = x_ref.shape
    k = (L - 1) // 2
    sort_ops = _sort_network(L)
    mad_ops = _mad_select_ops(L, k)
    inv_L = 1.0 / L

    w1, w2 = w_ref[0], w_ref[1]
    b1, b2 = b_ref[0], b_ref[1]

    # Process the block in lane chunks so the whole sorting network stays in
    # vregs (~2 f32 vregs per row) no matter how large the grid block TB is.
    cw = _LANE_CHUNK if TB % _LANE_CHUNK == 0 else 128
    for c0 in range(0, TB, cw):
        cs = slice(c0, c0 + cw)

        # Row-wise |x|: only one raw-x row is live at a time; raw x is re-read
        # at the very end for the sign (input block stays resident in VMEM).
        s = [jnp.abs(x_ref[i, :, cs].astype(jnp.float32)) for i in range(L)]

        # AdaptiveAvgPool1d(1) over L + BN-folded MLP + sigmoid.  MXU/EUP work,
        # independent of the median network -> the scheduler overlaps it.
        gap = s[0]
        for i in range(1, L):
            gap = gap + s[i]
        gap = gap * inv_L                                          # (C, cw)
        h = jnp.dot(w1, gap, preferred_element_type=jnp.float32) + b1
        h = jnp.maximum(h, 0.0)                                    # ReLU
        h = jnp.dot(w2, h, preferred_element_type=jnp.float32) + b2
        alpha = jax.nn.sigmoid(h)                                  # (C, cw)

        # Lower median (torch semantics) via the Batcher sort along L.
        for i, j in sort_ops:
            a, b = s[i], s[j]
            s[i] = jnp.minimum(a, b)
            s[j] = jnp.maximum(a, b)
        med = s[k]                                                 # (C, cw)

        # MAD: |sorted - med| is V-shaped (0 at index k) => bitonic; the pruned
        # one-sided merge leaves its lower median at index k.
        d = [med - s[i] if i <= k else s[i] - med for i in range(L)]
        for i, j, emit_min, emit_max in mad_ops:
            a, b = d[i], d[j]
            if emit_min:
                d[i] = jnp.minimum(a, b)
            if emit_max:
                d[j] = jnp.maximum(a, b)
        T = d[k] * alpha                                           # (C, cw)

        # Soft-threshold: sign(x) * max(|x| - T, 0); row-wise lane-dense stores.
        for i in range(L):
            xi = x_ref[i, :, cs].astype(jnp.float32)
            n_sub = jnp.maximum(jnp.abs(xi) - T, 0.0)
            o_ref[i, :, cs] = jnp.where(xi >= 0.0, n_sub, -n_sub).astype(o_ref.dtype)


# ---------------------------------------------------------------------------
# Generation-aware tiling + wrappers
# ---------------------------------------------------------------------------
def _tpu_defaults():
    """Generation-aware tile cap, vmem limit, and 2-TensorCore preference."""
    vmem_cap = 64 * 1024 * 1024
    two_tc = False
    try:
        info = pltpu.get_tpu_info()
        vmem_cap = int(getattr(info, "vmem_capacity_bytes", vmem_cap))
    except Exception:
        pass  # keep conservative (v7x-safe) defaults
    try:
        two_tc = "v7" in jax.devices()[0].device_kind.lower()
    except Exception:
        pass
    if vmem_cap >= 128 * 1024 * 1024:          # v5e / v6e: plenty of headroom
        return 2 * 1024 * 1024, 64 * 1024 * 1024, two_tc
    return 1 * 1024 * 1024, 32 * 1024 * 1024, two_tc   # v7x / unknown


def _pick_tile_batch(b_padded, c, l, max_tile_bytes, prefer_multi_step):
    """Largest lane-aligned (multiple of 128) batch tile dividing b_padded that
    fits the per-buffer cap and the static chunk-unroll cap.  Only keep >= 2
    grid steps (v7x's 2 TensorCores) when each block stays >= 512 KiB."""
    elem = 4
    cap = min(max_tile_bytes, _MAX_CHUNKS * _LANE_CHUNK * c * l * elem)
    cands = [t for t in range(128, b_padded + 1, 128)
             if b_padded % t == 0 and c * l * t * elem <= cap]
    if not cands:
        return 128
    if prefer_multi_step:
        multi = [t for t in cands
                 if b_padded // t >= 2 and c * l * t * elem >= 512 * 1024]
        if multi:
            return max(multi)
    return max(cands)


def acoustic_shrinkage_lcb(x_lcb, params):
    """Kernel entry in (L, C, B) layout, B a multiple of 128 (transpose-free)."""
    L, C, Bp = x_lcb.shape
    assert Bp % 128 == 0

    # Fold eval-mode BatchNorm1d into the first Linear (host-side, tiny).
    scale = params["gamma"] * jax.lax.rsqrt(params["running_var"] + EPS)
    w1e = (params["w1"] * scale[:, None]).astype(jnp.float32)
    b1e = ((params["b1"] - params["running_mean"]) * scale + params["beta"]).astype(jnp.float32)
    w_stack = jnp.stack([w1e, params["w2"].astype(jnp.float32)])              # (2, C, C)
    b_stack = jnp.stack([b1e, params["b2"].astype(jnp.float32)])[..., None]   # (2, C, 1)

    max_tile_bytes, vmem_limit, two_tc = _tpu_defaults()
    TB = _pick_tile_batch(Bp, C, L, max_tile_bytes, two_tc)
    grid = (Bp // TB,)

    n_sort = len(_sort_network(L))
    n_mad = sum(int(a) + int(b) for (_, _, a, b) in _mad_select_ops(L, (L - 1) // 2))

    return pl.pallas_call(
        shrinkage_kernel,
        out_shape=jax.ShapeDtypeStruct((L, C, Bp), x_lcb.dtype),
        grid=grid,
        in_specs=[
            pl.BlockSpec((L, C, TB), lambda i: (0, 0, i)),   # x (L, C, B-tile)
            pl.BlockSpec((2, C, C), lambda i: (0, 0, 0)),    # [w1', w2]
            pl.BlockSpec((2, C, 1), lambda i: (0, 0, 0)),    # [b1', b2]
        ],
        out_specs=pl.BlockSpec((L, C, TB), lambda i: (0, 0, i)),
        compiler_params=pltpu.CompilerParams(
            dimension_semantics=("parallel",),
            vmem_limit_bytes=vmem_limit,
        ),
        cost_estimate=pl.CostEstimate(
            flops=int(Bp * C * (2 * n_sort + n_mad + 8 * L + 4 * C + 8)),
            transcendentals=int(2 * Bp * C),
            bytes_accessed=int(8 * Bp * C * L),
        ),
    )(x_lcb, w_stack, b_stack)


def acoustic_shrinkage(x, params):
    """(B, C, L) convenience wrapper matching the torch module's layout.

    The pad + transpose on each side is pure layout plumbing (one extra HBM
    read+write of the tensor each way); keep the surrounding model in
    (L, C, B) layout and call acoustic_shrinkage_lcb directly to avoid it.
    """
    B, C, L = x.shape
    Bp = ((B + 127) // 128) * 128
    xp = x if Bp == B else jnp.pad(x, ((0, Bp - B), (0, 0), (0, 0)))
    x_t = jnp.transpose(xp, (2, 1, 0))                      # (L, C, Bp)
    out_t = acoustic_shrinkage_lcb(x_t, params)
    out = jnp.transpose(out_t, (2, 1, 0))                   # (Bp, C, L)
    return out[:B] if Bp != B else out


def reference_forward(x, params):
    """Pure-JAX reference mirroring the torch forward (eval-mode BN)."""
    L = x.shape[-1]
    k = (L - 1) // 2
    x_abs = jnp.abs(x)
    gap = jnp.mean(x_abs, axis=-1)
    h = gap @ params["w1"].T + params["b1"]
    h = (h - params["running_mean"]) / jnp.sqrt(params["running_var"] + EPS)
    h = h * params["gamma"] + params["beta"]
    h = jnp.maximum(h, 0.0)
    alpha = jax.nn.sigmoid(h @ params["w2"].T + params["b2"])
    med = jnp.sort(x_abs, axis=-1)[..., k:k + 1]            # torch lower median
    mad = jnp.sort(jnp.abs(x_abs - med), axis=-1)[..., k]
    T = (mad * alpha)[..., None]
    return jnp.sign(x) * jnp.maximum(x_abs - T, 0.0)


if __name__ == "__main__":
    C, L = 8, 16                      # channel, sequence length (gap_size = 1)
    key = jax.random.PRNGKey(0)
    kx, k1, k2, k3, k4, kx2 = jax.random.split(key, 6)
    bound = 1.0 / float(np.sqrt(C))   # PyTorch Linear default init range

    params = {
        "w1": jax.random.uniform(k1, (C, C), jnp.float32, -bound, bound),
        "b1": jax.random.uniform(k2, (C,), jnp.float32, -bound, bound),
        "gamma": jnp.ones((C,), jnp.float32),
        "beta": jnp.zeros((C,), jnp.float32),
        "running_mean": jnp.zeros((C,), jnp.float32),
        "running_var": jnp.ones((C,), jnp.float32),
        "w2": jax.random.uniform(k3, (C, C), jnp.float32, -bound, bound),
        "b2": jax.random.uniform(k4, (C,), jnp.float32, -bound, bound),
    }

    # Main case: lane-tiled batch, single large block (TB = 256).
    B = 256
    x = jax.random.normal(kx, (B, C, L), jnp.float32)
    out = acoustic_shrinkage(x, params)
    jax.block_until_ready(out)
    np.testing.assert_allclose(np.asarray(out),
                               np.asarray(reference_forward(x, params)),
                               rtol=2e-5, atol=2e-5)

    # Small, non-lane-aligned batch: exercises the pad-to-128 path.
    B2 = 6
    x2 = jax.random.normal(kx2, (B2, C, L), jnp.float32)
    out2 = acoustic_shrinkage(x2, params)
    jax.block_until_ready(out2)
    np.testing.assert_allclose(np.asarray(out2),
                               np.asarray(reference_forward(x2, params)),
                               rtol=2e-5, atol=2e-5)

    print("KERNEL_OK")
</pallas_src>

<mosaic_0001>
module attributes {stable_mosaic.version = 11 : i64} {
  func.func @shrinkage_kernel(%arg0: i32, %arg1: memref<16x8x256xf32, #tpu.memory_space<vmem>>, %arg2: memref<2x8x8xf32, #tpu.memory_space<vmem>>, %arg3: memref<2x8x1xf32, #tpu.memory_space<vmem>>, %arg4: memref<16x8x256xf32, #tpu.memory_space<vmem>>) attributes {dimension_semantics = [#tpu.dimension_semantics<parallel>], iteration_bounds = array<i64: 1>, scalar_prefetch = 0 : i64, scratch_operands = 0 : i64, tpu.core_type = #tpu.core_type<tc>, window_params = [{transform_indices = @transform_0, window_bounds = array<i64: 16, 8, 256>}, {pipeline_mode = #tpu.pipeline_mode<synchronous>, transform_indices = @transform_1, window_bounds = array<i64: 2, 8, 8>}, {pipeline_mode = #tpu.pipeline_mode<synchronous>, transform_indices = @transform_2, window_bounds = array<i64: 2, 8, 1>}, {transform_indices = @transform_3, window_bounds = array<i64: 16, 8, 256>}]} {
    %c0 = arith.constant 0 : index
    %c0_0 = arith.constant 0 : index
    %c0_1 = arith.constant 0 : index
    %0 = vector.load %arg2[%c0, %c0_0, %c0_1] : memref<2x8x8xf32, #tpu.memory_space<vmem>>, vector<1x8x8xf32>
    %1 = vector.shape_cast %0 : vector<1x8x8xf32> to vector<8x8xf32>
    %c1 = arith.constant 1 : index
    %c0_2 = arith.constant 0 : index
    %c0_3 = arith.constant 0 : index
    %2 = vector.load %arg2[%c1, %c0_2, %c0_3] : memref<2x8x8xf32, #tpu.memory_space<vmem>>, vector<1x8x8xf32>
    %3 = vector.shape_cast %2 : vector<1x8x8xf32> to vector<8x8xf32>
    %c0_4 = arith.constant 0 : index
    %c0_5 = arith.constant 0 : index
    %c0_6 = arith.constant 0 : index
    %4 = vector.load %arg3[%c0_4, %c0_5, %c0_6] : memref<2x8x1xf32, #tpu.memory_space<vmem>>, vector<1x8x1xf32>
    %5 = vector.shape_cast %4 : vector<1x8x1xf32> to vector<8x1xf32>
    %c1_7 = arith.constant 1 : index
    %c0_8 = arith.constant 0 : index
    %c0_9 = arith.constant 0 : index
    %6 = vector.load %arg3[%c1_7, %c0_8, %c0_9] : memref<2x8x1xf32, #tpu.memory_space<vmem>>, vector<1x8x1xf32>
    %7 = vector.shape_cast %6 : vector<1x8x1xf32> to vector<8x1xf32>
    %c0_10 = arith.constant 0 : index
    %c0_11 = arith.constant 0 : index
    %c0_12 = arith.constant 0 : index
    %8 = vector.load %arg1[%c0_10, %c0_11, %c0_12] : memref<16x8x256xf32, #tpu.memory_space<vmem>>, vector<1x8x256xf32>
    %9 = vector.shape_cast %8 : vector<1x8x256xf32> to vector<8x256xf32>
    %10 = math.absf %9 : vector<8x256xf32>
    %c1_13 = arith.constant 1 : index
    %c0_14 = arith.constant 0 : index
    %c0_15 = arith.constant 0 : index
    %11 = vector.load %arg1[%c1_13, %c0_14, %c0_15] : memref<16x8x256xf32, #tpu.memory_space<vmem>>, vector<1x8x256xf32>
    %12 = vector.shape_cast %11 : vector<1x8x256xf32> to vector<8x256xf32>
    %13 = math.absf %12 : vector<8x256xf32>
    %c2 = arith.constant 2 : index
    %c0_16 = arith.constant 0 : index
    %c0_17 = arith.constant 0 : index
    %14 = vector.load %arg1[%c2, %c0_16, %c0_17] : memref<16x8x256xf32, #tpu.memory_space<vmem>>, vector<1x8x256xf32>
    %15 = vector.shape_cast %14 : vector<1x8x256xf32> to vector<8x256xf32>
    %16 = math.absf %15 : vector<8x256xf32>
    %c3 = arith.constant 3 : index
    %c0_18 = arith.constant 0 : index
    %c0_19 = arith.constant 0 : index
    %17 = vector.load %arg1[%c3, %c0_18, %c0_19] : memref<16x8x256xf32, #tpu.memory_space<vmem>>, vector<1x8x256xf32>
    %18 = vector.shape_cast %17 : vector<1x8x256xf32> to vector<8x256xf32>
    %19 = math.absf %18 : vector<8x256xf32>
    %c4 = arith.constant 4 : index
    %c0_20 = arith.constant 0 : index
    %c0_21 = arith.constant 0 : index
    %20 = vector.load %arg1[%c4, %c0_20, %c0_21] : memref<16x8x256xf32, #tpu.memory_space<vmem>>, vector<1x8x256xf32>
    %21 = vector.shape_cast %20 : vector<1x8x256xf32> to vector<8x256xf32>
    %22 = math.absf %21 : vector<8x256xf32>
    %c5 = arith.constant 5 : index
    %c0_22 = arith.constant 0 : index
    %c0_23 = arith.constant 0 : index
    %23 = vector.load %arg1[%c5, %c0_22, %c0_23] : memref<16x8x256xf32, #tpu.memory_space<vmem>>, vector<1x8x256xf32>
    %24 = vector.shape_cast %23 : vector<1x8x256xf32> to vector<8x256xf32>
    %25 = math.absf %24 : vector<8x256xf32>
    %c6 = arith.constant 6 : index
    %c0_24 = arith.constant 0 : index
    %c0_25 = arith.constant 0 : index
    %26 = vector.load %arg1[%c6, %c0_24, %c0_25] : memref<16x8x256xf32, #tpu.memory_space<vmem>>, vector<1x8x256xf32>
    %27 = vector.shape_cast %26 : vector<1x8x256xf32> to vector<8x256xf32>
    %28 = math.absf %27 : vector<8x256xf32>
    %c7 = arith.constant 7 : index
    %c0_26 = arith.constant 0 : index
    %c0_27 = arith.constant 0 : index
    %29 = vector.load %arg1[%c7, %c0_26, %c0_27] : memref<16x8x256xf32, #tpu.memory_space<vmem>>, vector<1x8x256xf32>
    %30 = vector.shape_cast %29 : vector<1x8x256xf32> to vector<8x256xf32>
    %31 = math.absf %30 : vector<8x256xf32>
    %c8 = arith.constant 8 : index
    %c0_28 = arith.constant 0 : index
    %c0_29 = arith.constant 0 : index
    %32 = vector.load %arg1[%c8, %c0_28, %c0_29] : memref<16x8x256xf32, #tpu.memory_space<vmem>>, vector<1x8x256xf32>
    %33 = vector.shape_cast %32 : vector<1x8x256xf32> to vector<8x256xf32>
    %34 = math.absf %33 : vector<8x256xf32>
    %c9 = arith.constant 9 : index
    %c0_30 = arith.constant 0 : index
    %c0_31 = arith.constant 0 : index
    %35 = vector.load %arg1[%c9, %c0_30, %c0_31] : memref<16x8x256xf32, #tpu.memory_space<vmem>>, vector<1x8x256xf32>
    %36 = vector.shape_cast %35 : vector<1x8x256xf32> to vector<8x256xf32>
    %37 = math.absf %36 : vector<8x256xf32>
    %c10 = arith.constant 10 : index
    %c0_32 = arith.constant 0 : index
    %c0_33 = arith.constant 0 : index
    %38 = vector.load %arg1[%c10, %c0_32, %c0_33] : memref<16x8x256xf32, #tpu.memory_space<vmem>>, vector<1x8x256xf32>
    %39 = vector.shape_cast %38 : vector<1x8x256xf32> to vector<8x256xf32>
    %40 = math.absf %39 : vector<8x256xf32>
    %c11 = arith.constant 11 : index
    %c0_34 = arith.constant 0 : index
    %c0_35 = arith.constant 0 : index
    %41 = vector.load %arg1[%c11, %c0_34, %c0_35] : memref<16x8x256xf32, #tpu.memory_space<vmem>>, vector<1x8x256xf32>
    %42 = vector.shape_cast %41 : vector<1x8x256xf32> to vector<8x256xf32>
    %43 = math.absf %42 : vector<8x256xf32>
    %c12 = arith.constant 12 : index
    %c0_36 = arith.constant 0 : index
    %c0_37 = arith.constant 0 : index
    %44 = vector.load %arg1[%c12, %c0_36, %c0_37] : memref<16x8x256xf32, #tpu.memory_space<vmem>>, vector<1x8x256xf32>
    %45 = vector.shape_cast %44 : vector<1x8x256xf32> to vector<8x256xf32>
    %46 = math.absf %45 : vector<8x256xf32>
    %c13 = arith.constant 13 : index
    %c0_38 = arith.constant 0 : index
    %c0_39 = arith.constant 0 : index
    %47 = vector.load %arg1[%c13, %c0_38, %c0_39] : memref<16x8x256xf32, #tpu.memory_space<vmem>>, vector<1x8x256xf32>
    %48 = vector.shape_cast %47 : vector<1x8x256xf32> to vector<8x256xf32>
    %49 = math.absf %48 : vector<8x256xf32>
    %c14 = arith.constant 14 : index
    %c0_40 = arith.constant 0 : index
    %c0_41 = arith.constant 0 : index
    %50 = vector.load %arg1[%c14, %c0_40, %c0_41] : memref<16x8x256xf32, #tpu.memory_space<vmem>>, vector<1x8x256xf32>
    %51 = vector.shape_cast %50 : vector<1x8x256xf32> to vector<8x256xf32>
    %52 = math.absf %51 : vector<8x256xf32>
    %c15 = arith.constant 15 : index
    %c0_42 = arith.constant 0 : index
    %c0_43 = arith.constant 0 : index
    %53 = vector.load %arg1[%c15, %c0_42, %c0_43] : memref<16x8x256xf32, #tpu.memory_space<vmem>>, vector<1x8x256xf32>
    %54 = vector.shape_cast %53 : vector<1x8x256xf32> to vector<8x256xf32>
    %55 = math.absf %54 : vector<8x256xf32>
    %56 = arith.addf %10, %13 : vector<8x256xf32>
    %57 = arith.addf %56, %16 : vector<8x256xf32>
    %58 = arith.addf %57, %19 : vector<8x256xf32>
    %59 = arith.addf %58, %22 : vector<8x256xf32>
    %60 = arith.addf %59, %25 : vector<8x256xf32>
    %61 = arith.addf %60, %28 : vector<8x256xf32>
    %62 = arith.addf %61, %31 : vector<8x256xf32>
    %63 = arith.addf %62, %34 : vector<8x256xf32>
    %64 = arith.addf %63, %37 : vector<8x256xf32>
    %65 = arith.addf %64, %40 : vector<8x256xf32>
    %66 = arith.addf %65, %43 : vector<8x256xf32>
    %67 = arith.addf %66, %46 : vector<8x256xf32>
    %68 = arith.addf %67, %49 : vector<8x256xf32>
    %69 = arith.addf %68, %52 : vector<8x256xf32>
    %70 = arith.addf %69, %55 : vector<8x256xf32>
    %cst = arith.constant 6.250000e-02 : f32
    %71 = vector.broadcast %cst : f32 to vector<8x256xf32>
    %72 = arith.mulf %70, %71 : vector<8x256xf32>
    %cst_44 = arith.constant dense<0.000000e+00> : vector<8x256xf32>
    %73 = tpu.matmul %1, %72, %cst_44 {dimension_numbers = #tpu.dot_dimension_numbers<[1], [0], [0], [1], [0, 0, 1, 1], [], []>} : vector<8x8xf32>, vector<8x256xf32>, vector<8x256xf32> -> vector<8x256xf32>
    %74 = vector.broadcast %5 : vector<8x1xf32> to vector<8x256xf32>
    %75 = arith.addf %73, %74 : vector<8x256xf32>
    %cst_45 = arith.constant 0.000000e+00 : f32
    %76 = vector.broadcast %cst_45 : f32 to vector<8x256xf32>
    %77 = arith.maximumf %75, %76 : vector<8x256xf32>
    %cst_46 = arith.constant dense<0.000000e+00> : vector<8x256xf32>
    %78 = tpu.matmul %3, %77, %cst_46 {dimension_numbers = #tpu.dot_dimension_numbers<[1], [0], [0], [1], [0, 0, 1, 1], [], []>} : vector<8x8xf32>, vector<8x256xf32>, vector<8x256xf32> -> vector<8x256xf32>
    %79 = vector.broadcast %7 : vector<8x1xf32> to vector<8x256xf32>
    %80 = arith.addf %78, %79 : vector<8x256xf32>
    %81 = arith.negf %80 : vector<8x256xf32>
    %82 = math.exp %81 : vector<8x256xf32>
    %cst_47 = arith.constant 1.000000e+00 : f32
    %83 = vector.broadcast %cst_47 : f32 to vector<8x256xf32>
    %84 = arith.addf %83, %82 : vector<8x256xf32>
    %85 = arith.divf %83, %84 : vector<8x256xf32>
    %86 = arith.minimumf %10, %34 : vector<8x256xf32>
    %87 = arith.maximumf %10, %34 : vector<8x256xf32>
    %88 = arith.minimumf %13, %37 : vector<8x256xf32>
    %89 = arith.maximumf %13, %37 : vector<8x256xf32>
    %90 = arith.minimumf %16, %40 : vector<8x256xf32>
    %91 = arith.maximumf %16, %40 : vector<8x256xf32>
    %92 = arith.minimumf %19, %43 : vector<8x256xf32>
    %93 = arith.maximumf %19, %43 : vector<8x256xf32>
    %94 = arith.minimumf %22, %46 : vector<8x256xf32>
    %95 = arith.maximumf %22, %46 : vector<8x256xf32>
    %96 = arith.minimumf %25, %49 : vector<8x256xf32>
    %97 = arith.maximumf %25, %49 : vector<8x256xf32>
    %98 = arith.minimumf %28, %52 : vector<8x256xf32>
    %99 = arith.maximumf %28, %52 : vector<8x256xf32>
    %100 = arith.minimumf %31, %55 : vector<8x256xf32>
    %101 = arith.maximumf %31, %55 : vector<8x256xf32>
    %102 = arith.minimumf %86, %94 : vector<8x256xf32>
    %103 = arith.maximumf %86, %94 : vector<8x256xf32>
    %104 = arith.minimumf %88, %96 : vector<8x256xf32>
    %105 = arith.maximumf %88, %96 : vector<8x256xf32>
    %106 = arith.minimumf %90, %98 : vector<8x256xf32>
    %107 = arith.maximumf %90, %98 : vector<8x256xf32>
    %108 = arith.minimumf %92, %100 : vector<8x256xf32>
    %109 = arith.maximumf %92, %100 : vector<8x256xf32>
    %110 = arith.minimumf %87, %95 : vector<8x256xf32>
    %111 = arith.maximumf %87, %95 : vector<8x256xf32>
    %112 = arith.minimumf %89, %97 : vector<8x256xf32>
    %113 = arith.maximumf %89, %97 : vector<8x256xf32>
    %114 = arith.minimumf %91, %99 : vector<8x256xf32>
    %115 = arith.maximumf %91, %99 : vector<8x256xf32>
    %116 = arith.minimumf %93, %101 : vector<8x256xf32>
    %117 = arith.maximumf %93, %101 : vector<8x256xf32>
    %118 = arith.minimumf %103, %110 : vector<8x256xf32>
    %119 = arith.maximumf %103, %110 : vector<8x256xf32>
    %120 = arith.minimumf %105, %112 : vector<8x256xf32>
    %121 = arith.maximumf %105, %112 : vector<8x256xf32>
    %122 = arith.minimumf %107, %114 : vector<8x256xf32>
    %123 = arith.maximumf %107, %114 : vector<8x256xf32>
    %124 = arith.minimumf %109, %116 : vector<8x256xf32>
    %125 = arith.maximumf %109, %116 : vector<8x256xf32>
    %126 = arith.minimumf %102, %106 : vector<8x256xf32>
    %127 = arith.maximumf %102, %106 : vector<8x256xf32>
    %128 = arith.minimumf %104, %108 : vector<8x256xf32>
    %129 = arith.maximumf %104, %108 : vector<8x256xf32>
    %130 = arith.minimumf %118, %122 : vector<8x256xf32>
    %131 = arith.maximumf %118, %122 : vector<8x256xf32>
    %132 = arith.minimumf %120, %124 : vector<8x256xf32>
    %133 = arith.maximumf %120, %124 : vector<8x256xf32>
    %134 = arith.minimumf %119, %123 : vector<8x256xf32>
    %135 = arith.maximumf %119, %123 : vector<8x256xf32>
    %136 = arith.minimumf %121, %125 : vector<8x256xf32>
    %137 = arith.maximumf %121, %125 : vector<8x256xf32>
    %138 = arith.minimumf %111, %115 : vector<8x256xf32>
    %139 = arith.maximumf %111, %115 : vector<8x256xf32>
    %140 = arith.minimumf %113, %117 : vector<8x256xf32>
    %141 = arith.maximumf %113, %117 : vector<8x256xf32>
    %142 = arith.minimumf %127, %134 : vector<8x256xf32>
    %143 = arith.maximumf %127, %134 : vector<8x256xf32>
    %144 = arith.minimumf %129, %136 : vector<8x256xf32>
    %145 = arith.maximumf %129, %136 : vector<8x256xf32>
    %146 = arith.minimumf %131, %138 : vector<8x256xf32>
    %147 = arith.maximumf %131, %138 : vector<8x256xf32>
    %148 = arith.minimumf %133, %140 : vector<8x256xf32>
    %149 = arith.maximumf %133, %140 : vector<8x256xf32>
    %150 = arith.minimumf %142, %130 : vector<8x256xf32>
    %151 = arith.maximumf %142, %130 : vector<8x256xf32>
    %152 = arith.minimumf %144, %132 : vector<8x256xf32>
    %153 = arith.maximumf %144, %132 : vector<8x256xf32>
    %154 = arith.minimumf %146, %143 : vector<8x256xf32>
    %155 = arith.maximumf %146, %143 : vector<8x256xf32>
    %156 = arith.minimumf %148, %145 : vector<8x256xf32>
    %157 = arith.maximumf %148, %145 : vector<8x256xf32>
    %158 = arith.minimumf %135, %147 : vector<8x256xf32>
    %159 = arith.maximumf %135, %147 : vector<8x256xf32>
    %160 = arith.minimumf %137, %149 : vector<8x256xf32>
    %161 = arith.maximumf %137, %149 : vector<8x256xf32>
    %162 = arith.minimumf %126, %128 : vector<8x256xf32>
    %163 = arith.maximumf %126, %128 : vector<8x256xf32>
    %164 = arith.minimumf %150, %152 : vector<8x256xf32>
    %165 = arith.maximumf %150, %152 : vector<8x256xf32>
    %166 = arith.minimumf %151, %153 : vector<8x256xf32>
    %167 = arith.maximumf %151, %153 : vector<8x256xf32>
    %168 = arith.minimumf %154, %156 : vector<8x256xf32>
    %169 = arith.maximumf %154, %156 : vector<8x256xf32>
    %170 = arith.minimumf %155, %157 : vector<8x256xf32>
    %171 = arith.maximumf %155, %157 : vector<8x256xf32>
    %172 = arith.minimumf %158, %160 : vector<8x256xf32>
    %173 = arith.maximumf %158, %160 : vector<8x256xf32>
    %174 = arith.minimumf %159, %161 : vector<8x256xf32>
    %175 = arith.maximumf %159, %161 : vector<8x256xf32>
    %176 = arith.minimumf %139, %141 : vector<8x256xf32>
    %177 = arith.maximumf %139, %141 : vector<8x256xf32>
    %178 = arith.minimumf %163, %170 : vector<8x256xf32>
    %179 = arith.maximumf %163, %170 : vector<8x256xf32>
    %180 = arith.minimumf %165, %172 : vector<8x256xf32>
    %181 = arith.maximumf %165, %172 : vector<8x256xf32>
    %182 = arith.minimumf %167, %174 : vector<8x256xf32>
    %183 = arith.maximumf %167, %174 : vector<8x256xf32>
    %184 = arith.minimumf %169, %176 : vector<8x256xf32>
    %185 = arith.maximumf %169, %176 : vector<8x256xf32>
    %186 = arith.minimumf %178, %166 : vector<8x256xf32>
    %187 = arith.maximumf %178, %166 : vector<8x256xf32>
    %188 = arith.minimumf %180, %168 : vector<8x256xf32>
    %189 = arith.maximumf %180, %168 : vector<8x256xf32>
    %190 = arith.minimumf %182, %179 : vector<8x256xf32>
    %191 = arith.maximumf %182, %179 : vector<8x256xf32>
    %192 = arith.minimumf %184, %181 : vector<8x256xf32>
    %193 = arith.maximumf %184, %181 : vector<8x256xf32>
    %194 = arith.minimumf %171, %183 : vector<8x256xf32>
    %195 = arith.maximumf %171, %183 : vector<8x256xf32>
    %196 = arith.minimumf %173, %185 : vector<8x256xf32>
    %197 = arith.maximumf %173, %185 : vector<8x256xf32>
    %198 = arith.minimumf %186, %164 : vector<8x256xf32>
    %199 = arith.maximumf %186, %164 : vector<8x256xf32>
    %200 = arith.minimumf %188, %187 : vector<8x256xf32>
    %201 = arith.maximumf %188, %187 : vector<8x256xf32>
    %202 = arith.minimumf %190, %189 : vector<8x256xf32>
    %203 = arith.maximumf %190, %189 : vector<8x256xf32>
    %204 = arith.minimumf %192, %191 : vector<8x256xf32>
    %205 = arith.maximumf %192, %191 : vector<8x256xf32>
    %206 = arith.minimumf %194, %193 : vector<8x256xf32>
    %207 = arith.maximumf %194, %193 : vector<8x256xf32>
    %208 = arith.minimumf %196, %195 : vector<8x256xf32>
    %209 = arith.maximumf %196, %195 : vector<8x256xf32>
    %210 = arith.minimumf %175, %197 : vector<8x256xf32>
    %211 = arith.maximumf %175, %197 : vector<8x256xf32>
    %212 = arith.subf %204, %162 : vector<8x256xf32>
    %213 = arith.subf %204, %198 : vector<8x256xf32>
    %214 = arith.subf %204, %199 : vector<8x256xf32>
    %215 = arith.subf %204, %200 : vector<8x256xf32>
    %216 = arith.subf %204, %201 : vector<8x256xf32>
    %217 = arith.subf %204, %202 : vector<8x256xf32>
    %218 = arith.subf %204, %203 : vector<8x256xf32>
    %219 = arith.subf %204, %204 : vector<8x256xf32>
    %220 = arith.subf %205, %204 : vector<8x256xf32>
    %221 = arith.subf %206, %204 : vector<8x256xf32>
    %222 = arith.subf %207, %204 : vector<8x256xf32>
    %223 = arith.subf %208, %204 : vector<8x256xf32>
    %224 = arith.subf %209, %204 : vector<8x256xf32>
    %225 = arith.subf %210, %204 : vector<8x256xf32>
    %226 = arith.subf %211, %204 : vector<8x256xf32>
    %227 = arith.subf %177, %204 : vector<8x256xf32>
    %228 = arith.minimumf %212, %220 : vector<8x256xf32>
    %229 = arith.minimumf %213, %221 : vector<8x256xf32>
    %230 = arith.minimumf %214, %222 : vector<8x256xf32>
    %231 = arith.minimumf %215, %223 : vector<8x256xf32>
    %232 = arith.minimumf %216, %224 : vector<8x256xf32>
    %233 = arith.minimumf %217, %225 : vector<8x256xf32>
    %234 = arith.minimumf %218, %226 : vector<8x256xf32>
    %235 = arith.minimumf %219, %227 : vector<8x256xf32>
    %236 = arith.maximumf %228, %232 : vector<8x256xf32>
    %237 = arith.maximumf %229, %233 : vector<8x256xf32>
    %238 = arith.maximumf %230, %234 : vector<8x256xf32>
    %239 = arith.maximumf %231, %235 : vector<8x256xf32>
    %240 = arith.maximumf %236, %238 : vector<8x256xf32>
    %241 = arith.maximumf %237, %239 : vector<8x256xf32>
    %242 = arith.maximumf %240, %241 : vector<8x256xf32>
    %243 = arith.mulf %242, %85 : vector<8x256xf32>
    %c0_48 = arith.constant 0 : index
    %c0_49 = arith.constant 0 : index
    %c0_50 = arith.constant 0 : index
    %244 = vector.load %arg1[%c0_48, %c0_49, %c0_50] : memref<16x8x256xf32, #tpu.memory_space<vmem>>, vector<1x8x256xf32>
    %245 = vector.shape_cast %244 : vector<1x8x256xf32> to vector<8x256xf32>
    %246 = math.absf %245 : vector<8x256xf32>
    %247 = arith.subf %246, %243 : vector<8x256xf32>
    %cst_51 = arith.constant 0.000000e+00 : f32
    %248 = vector.broadcast %cst_51 : f32 to vector<8x256xf32>
    %249 = arith.maximumf %247, %248 : vector<8x256xf32>
    %cst_52 = arith.constant 0.000000e+00 : f32
    %250 = vector.broadcast %cst_52 : f32 to vector<8x256xf32>
    %251 = arith.cmpf oge, %245, %250 : vector<8x256xf32>
    %cst_53 = arith.constant 0.000000e+00 : f32
    %252 = vector.broadcast %cst_53 : f32 to vector<8x256xf32>
    %253 = arith.subf %252, %249 : vector<8x256xf32>
    %254 = arith.select %251, %249, %253 : vector<8x256xi1>, vector<8x256xf32>
    %c0_54 = arith.constant 0 : index
    %c0_55 = arith.constant 0 : index
    %c0_56 = arith.constant 0 : index
    %255 = vector.load %arg4[%c0_54, %c0_55, %c0_56] : memref<16x8x256xf32, #tpu.memory_space<vmem>>, vector<1x8x256xf32>
    %256 = vector.shape_cast %255 : vector<1x8x256xf32> to vector<8x256xf32>
    %257 = vector.shape_cast %254 : vector<8x256xf32> to vector<1x8x256xf32>
    tpu.vector_store %arg4[%c0_54, %c0_55, %c0_56], %257 {strides = array<i32>} : memref<16x8x256xf32, #tpu.memory_space<vmem>>, vector<1x8x256xf32>,
    %c1_57 = arith.constant 1 : index
    %c0_58 = arith.constant 0 : index
    %c0_59 = arith.constant 0 : index
    %258 = vector.load %arg1[%c1_57, %c0_58, %c0_59] : memref<16x8x256xf32, #tpu.memory_space<vmem>>, vector<1x8x256xf32>
    %259 = vector.shape_cast %258 : vector<1x8x256xf32> to vector<8x256xf32>
    %260 = math.absf %259 : vector<8x256xf32>
    %261 = arith.subf %260, %243 : vector<8x256xf32>
    %cst_60 = arith.constant 0.000000e+00 : f32
    %262 = vector.broadcast %cst_60 : f32 to vector<8x256xf32>
    %263 = arith.maximumf %261, %262 : vector<8x256xf32>
    %cst_61 = arith.constant 0.000000e+00 : f32
    %264 = vector.broadcast %cst_61 : f32 to vector<8x256xf32>
    %265 = arith.cmpf oge, %259, %264 : vector<8x256xf32>
    %cst_62 = arith.constant 0.000000e+00 : f32
    %266 = vector.broadcast %cst_62 : f32 to vector<8x256xf32>
    %267 = arith.subf %266, %263 : vector<8x256xf32>
    %268 = arith.select %265, %263, %267 : vector<8x256xi1>, vector<8x256xf32>
    %c1_63 = arith.constant 1 : index
    %c0_64 = arith.constant 0 : index
    %c0_65 = arith.constant 0 : index
    %269 = vector.load %arg4[%c1_63, %c0_64, %c0_65] : memref<16x8x256xf32, #tpu.memory_space<vmem>>, vector<1x8x256xf32>
    %270 = vector.shape_cast %269 : vector<1x8x256xf32> to vector<8x256xf32>
    %271 = vector.shape_cast %268 : vector<8x256xf32> to vector<1x8x256xf32>
    tpu.vector_store %arg4[%c1_63, %c0_64, %c0_65], %271 {strides = array<i32>} : memref<16x8x256xf32, #tpu.memory_space<vmem>>, vector<1x8x256xf32>,
    %c2_66 = arith.constant 2 : index
    %c0_67 = arith.constant 0 : index
    %c0_68 = arith.constant 0 : index
    %272 = vector.load %arg1[%c2_66, %c0_67, %c0_68] : memref<16x8x256xf32, #tpu.memory_space<vmem>>, vector<1x8x256xf32>
    %273 = vector.shape_cast %272 : vector<1x8x256xf32> to vector<8x256xf32>
    %274 = math.absf %273 : vector<8x256xf32>
    %275 = arith.subf %274, %243 : vector<8x256xf32>
    %cst_69 = arith.constant 0.000000e+00 : f32
    %276 = vector.broadcast %cst_69 : f32 to vector<8x256xf32>
    %277 = arith.maximumf %275, %276 : vector<8x256xf32>
    %cst_70 = arith.constant 0.000000e+00 : f32
    %278 = vector.broadcast %cst_70 : f32 to vector<8x256xf32>
    %279 = arith.cmpf oge, %273, %278 : vector<8x256xf32>
    %cst_71 = arith.constant 0.000000e+00 : f32
    %280 = vector.broadcast %cst_71 : f32 to vector<8x256xf32>
    %281 = arith.subf %280, %277 : vector<8x256xf32>
    %282 = arith.select %279, %277, %281 : vector<8x256xi1>, vector<8x256xf32>
    %c2_72 = arith.constant 2 : index
    %c0_73 = arith.constant 0 : index
    %c0_74 = arith.constant 0 : index
    %283 = vector.load %arg4[%c2_72, %c0_73, %c0_74] : memref<16x8x256xf32, #tpu.memory_space<vmem>>, vector<1x8x256xf32>
    %284 = vector.shape_cast %283 : vector<1x8x256xf32> to vector<8x256xf32>
    %285 = vector.shape_cast %282 : vector<8x256xf32> to vector<1x8x256xf32>
    tpu.vector_store %arg4[%c2_72, %c0_73, %c0_74], %285 {strides = array<i32>} : memref<16x8x256xf32, #tpu.memory_space<vmem>>, vector<1x8x256xf32>,
    %c3_75 = arith.constant 3 : index
    %c0_76 = arith.constant 0 : index
    %c0_77 = arith.constant 0 : index
    %286 = vector.load %arg1[%c3_75, %c0_76, %c0_77] : memref<16x8x256xf32, #tpu.memory_space<vmem>>, vector<1x8x256xf32>
    %287 = vector.shape_cast %286 : vector<1x8x256xf32> to vector<8x256xf32>
    %288 = math.absf %287 : vector<8x256xf32>
    %289 = arith.subf %288, %243 : vector<8x256xf32>
    %cst_78 = arith.constant 0.000000e+00 : f32
    %290 = vector.broadcast %cst_78 : f32 to vector<8x256xf32>
    %291 = arith.maximumf %289, %290 : vector<8x256xf32>
    %cst_79 = arith.constant 0.000000e+00 : f32
    %292 = vector.broadcast %cst_79 : f32 to vector<8x256xf32>
    %293 = arith.cmpf oge, %287, %292 : vector<8x256xf32>
    %cst_80 = arith.constant 0.000000e+00 : f32
    %294 = vector.broadcast %cst_80 : f32 to vector<8x256xf32>
    %295 = arith.subf %294, %291 : vector<8x256xf32>
    %296 = arith.select %293, %291, %295 : vector<8x256xi1>, vector<8x256xf32>
    %c3_81 = arith.constant 3 : index
    %c0_82 = arith.constant 0 : index
    %c0_83 = arith.constant 0 : index
    %297 = vector.load %arg4[%c3_81, %c0_82, %c0_83] : memref<16x8x256xf32, #tpu.memory_space<vmem>>, vector<1x8x256xf32>
    %298 = vector.shape_cast %297 : vector<1x8x256xf32> to vector<8x256xf32>
    %299 = vector.shape_cast %296 : vector<8x256xf32> to vector<1x8x256xf32>
    tpu.vector_store %arg4[%c3_81, %c0_82, %c0_83], %299 {strides = array<i32>} : memref<16x8x256xf32, #tpu.memory_space<vmem>>, vector<1x8x256xf32>,
    %c4_84 = arith.constant 4 : index
    %c0_85 = arith.constant 0 : index
    %c0_86 = arith.constant 0 : index
    %300 = vector.load %arg1[%c4_84, %c0_85, %c0_86] : memref<16x8x256xf32, #tpu.memory_space<vmem>>, vector<1x8x256xf32>
    %301 = vector.shape_cast %300 : vector<1x8x256xf32> to vector<8x256xf32>
    %302 = math.absf %301 : vector<8x256xf32>
    %303 = arith.subf %302, %243 : vector<8x256xf32>
    %cst_87 = arith.constant 0.000000e+00 : f32
    %304 = vector.broadcast %cst_87 : f32 to vector<8x256xf32>
    %305 = arith.maximumf %303, %304 : vector<8x256xf32>
    %cst_88 = arith.constant 0.000000e+00 : f32
    %306 = vector.broadcast %cst_88 : f32 to vector<8x256xf32>
    %307 = arith.cmpf oge, %301, %306 : vector<8x256xf32>
    %cst_89 = arith.constant 0.000000e+00 : f32
    %308 = vector.broadcast %cst_89 : f32 to vector<8x256xf32>
    %309 = arith.subf %308, %305 : vector<8x256xf32>
    %310 = arith.select %307, %305, %309 : vector<8x256xi1>, vector<8x256xf32>
    %c4_90 = arith.constant 4 : index
    %c0_91 = arith.constant 0 : index
    %c0_92 = arith.constant 0 : index
    %311 = vector.load %arg4[%c4_90, %c0_91, %c0_92] : memref<16x8x256xf32, #tpu.memory_space<vmem>>, vector<1x8x256xf32>
    %312 = vector.shape_cast %311 : vector<1x8x256xf32> to vector<8x256xf32>
    %313 = vector.shape_cast %310 : vector<8x256xf32> to vector<1x8x256xf32>
    tpu.vector_store %arg4[%c4_90, %c0_91, %c0_92], %313 {strides = array<i32>} : memref<16x8x256xf32, #tpu.memory_space<vmem>>, vector<1x8x256xf32>,
    %c5_93 = arith.constant 5 : index
    %c0_94 = arith.constant 0 : index
    %c0_95 = arith.constant 0 : index
    %314 = vector.load %arg1[%c5_93, %c0_94, %c0_95] : memref<16x8x256xf32, #tpu.memory_space<vmem>>, vector<1x8x256xf32>
    %315 = vector.shape_cast %314 : vector<1x8x256xf32> to vector<8x256xf32>
    %316 = math.absf %315 : vector<8x256xf32>
    %317 = arith.subf %316, %243 : vector<8x256xf32>
    %cst_96 = arith.constant 0.000000e+00 : f32
    %318 = vector.broadcast %cst_96 : f32 to vector<8x256xf32>
    %319 = arith.maximumf %317, %318 : vector<8x256xf32>
    %cst_97 = arith.constant 0.000000e+00 : f32
    %320 = vector.broadcast %cst_97 : f32 to vector<8x256xf32>
    %321 = arith.cmpf oge, %315, %320 : vector<8x256xf32>
    %cst_98 = arith.constant 0.000000e+00 : f32
    %322 = vector.broadcast %cst_98 : f32 to vector<8x256xf32>
    %323 = arith.subf %322, %319 : vector<8x256xf32>
    %324 = arith.select %321, %319, %323 : vector<8x256xi1>, vector<8x256xf32>
    %c5_99 = arith.constant 5 : index
    %c0_100 = arith.constant 0 : index
    %c0_101 = arith.constant 0 : index
    %325 = vector.load %arg4[%c5_99, %c0_100, %c0_101] : memref<16x8x256xf32, #tpu.memory_space<vmem>>, vector<1x8x256xf32>
    %326 = vector.shape_cast %325 : vector<1x8x256xf32> to vector<8x256xf32>
    %327 = vector.shape_cast %324 : vector<8x256xf32> to vector<1x8x256xf32>
    tpu.vector_store %arg4[%c5_99, %c0_100, %c0_101], %327 {strides = array<i32>} : memref<16x8x256xf32, #tpu.memory_space<vmem>>, vector<1x8x256xf32>,
    %c6_102 = arith.constant 6 : index
    %c0_103 = arith.constant 0 : index
    %c0_104 = arith.constant 0 : index
    %328 = vector.load %arg1[%c6_102, %c0_103, %c0_104] : memref<16x8x256xf32, #tpu.memory_space<vmem>>, vector<1x8x256xf32>
    %329 = vector.shape_cast %328 : vector<1x8x256xf32> to vector<8x256xf32>
    %330 = math.absf %329 : vector<8x256xf32>
    %331 = arith.subf %330, %243 : vector<8x256xf32>
    %cst_105 = arith.constant 0.000000e+00 : f32
    %332 = vector.broadcast %cst_105 : f32 to vector<8x256xf32>
    %333 = arith.maximumf %331, %332 : vector<8x256xf32>
    %cst_106 = arith.constant 0.000000e+00 : f32
    %334 = vector.broadcast %cst_106 : f32 to vector<8x256xf32>
    %335 = arith.cmpf oge, %329, %334 : vector<8x256xf32>
    %cst_107 = arith.constant 0.000000e+00 : f32
    %336 = vector.broadcast %cst_107 : f32 to vector<8x256xf32>
    %337 = arith.subf %336, %333 : vector<8x256xf32>
    %338 = arith.select %335, %333, %337 : vector<8x256xi1>, vector<8x256xf32>
    %c6_108 = arith.constant 6 : index
    %c0_109 = arith.constant 0 : index
    %c0_110 = arith.constant 0 : index
    %339 = vector.load %arg4[%c6_108, %c0_109, %c0_110] : memref<16x8x256xf32, #tpu.memory_space<vmem>>, vector<1x8x256xf32>
    %340 = vector.shape_cast %339 : vector<1x8x256xf32> to vector<8x256xf32>
    %341 = vector.shape_cast %338 : vector<8x256xf32> to vector<1x8x256xf32>
    tpu.vector_store %arg4[%c6_108, %c0_109, %c0_110], %341 {strides = array<i32>} : memref<16x8x256xf32, #tpu.memory_space<vmem>>, vector<1x8x256xf32>,
    %c7_111 = arith.constant 7 : index
    %c0_112 = arith.constant 0 : index
    %c0_113 = arith.constant 0 : index
    %342 = vector.load %arg1[%c7_111, %c0_112, %c0_113] : memref<16x8x256xf32, #tpu.memory_space<vmem>>, vector<1x8x256xf32>
    %343 = vector.shape_cast %342 : vector<1x8x256xf32> to vector<8x256xf32>
    %344 = math.absf %343 : vector<8x256xf32>
    %345 = arith.subf %344, %243 : vector<8x256xf32>
    %cst_114 = arith.constant 0.000000e+00 : f32
    %346 = vector.broadcast %cst_114 : f32 to vector<8x256xf32>
    %347 = arith.maximumf %345, %346 : vector<8x256xf32>
    %cst_115 = arith.constant 0.000000e+00 : f32
    %348 = vector.broadcast %cst_115 : f32 to vector<8x256xf32>
    %349 = arith.cmpf oge, %343, %348 : vector<8x256xf32>
    %cst_116 = arith.constant 0.000000e+00 : f32
    %350 = vector.broadcast %cst_116 : f32 to vector<8x256xf32>
    %351 = arith.subf %350, %347 : vector<8x256xf32>
    %352 = arith.select %349, %347, %351 : vector<8x256xi1>, vector<8x256xf32>
    %c7_117 = arith.constant 7 : index
    %c0_118 = arith.constant 0 : index
    %c0_119 = arith.constant 0 : index
    %353 = vector.load %arg4[%c7_117, %c0_118, %c0_119] : memref<16x8x256xf32, #tpu.memory_space<vmem>>, vector<1x8x256xf32>
    %354 = vector.shape_cast %353 : vector<1x8x256xf32> to vector<8x256xf32>
    %355 = vector.shape_cast %352 : vector<8x256xf32> to vector<1x8x256xf32>
    tpu.vector_store %arg4[%c7_117, %c0_118, %c0_119], %355 {strides = array<i32>} : memref<16x8x256xf32, #tpu.memory_space<vmem>>, vector<1x8x256xf32>,
    %c8_120 = arith.constant 8 : index
    %c0_121 = arith.constant 0 : index
    %c0_122 = arith.constant 0 : index
    %356 = vector.load %arg1[%c8_120, %c0_121, %c0_122] : memref<16x8x256xf32, #tpu.memory_space<vmem>>, vector<1x8x256xf32>
    %357 = vector.shape_cast %356 : vector<1x8x256xf32> to vector<8x256xf32>
    %358 = math.absf %357 : vector<8x256xf32>
    %359 = arith.subf %358, %243 : vector<8x256xf32>
    %cst_123 = arith.constant 0.000000e+00 : f32
    %360 = vector.broadcast %cst_123 : f32 to vector<8x256xf32>
    %361 = arith.maximumf %359, %360 : vector<8x256xf32>
    %cst_124 = arith.constant 0.000000e+00 : f32
    %362 = vector.broadcast %cst_124 : f32 to vector<8x256xf32>
    %363 = arith.cmpf oge, %357, %362 : vector<8x256xf32>
    %cst_125 = arith.constant 0.000000e+00 : f32
    %364 = vector.broadcast %cst_125 : f32 to vector<8x256xf32>
    %365 = arith.subf %364, %361 : vector<8x256xf32>
    %366 = arith.select %363, %361, %365 : vector<8x256xi1>, vector<8x256xf32>
    %c8_126 = arith.constant 8 : index
    %c0_127 = arith.constant 0 : index
    %c0_128 = arith.constant 0 : index
    %367 = vector.load %arg4[%c8_126, %c0_127, %c0_128] : memref<16x8x256xf32, #tpu.memory_space<vmem>>, vector<1x8x256xf32>
    %368 = vector.shape_cast %367 : vector<1x8x256xf32> to vector<8x256xf32>
    %369 = vector.shape_cast %366 : vector<8x256xf32> to vector<1x8x256xf32>
    tpu.vector_store %arg4[%c8_126, %c0_127, %c0_128], %369 {strides = array<i32>} : memref<16x8x256xf32, #tpu.memory_space<vmem>>, vector<1x8x256xf32>,
    %c9_129 = arith.constant 9 : index
    %c0_130 = arith.constant 0 : index
    %c0_131 = arith.constant 0 : index
    %370 = vector.load %arg1[%c9_129, %c0_130, %c0_131] : memref<16x8x256xf32, #tpu.memory_space<vmem>>, vector<1x8x256xf32>
    %371 = vector.shape_cast %370 : vector<1x8x256xf32> to vector<8x256xf32>
    %372 = math.absf %371 : vector<8x256xf32>
    %373 = arith.subf %372, %243 : vector<8x256xf32>
    %cst_132 = arith.constant 0.000000e+00 : f32
    %374 = vector.broadcast %cst_132 : f32 to vector<8x256xf32>
    %375 = arith.maximumf %373, %374 : vector<8x256xf32>
    %cst_133 = arith.constant 0.000000e+00 : f32
    %376 = vector.broadcast %cst_133 : f32 to vector<8x256xf32>
    %377 = arith.cmpf oge, %371, %376 : vector<8x256xf32>
    %cst_134 = arith.constant 0.000000e+00 : f32
    %378 = vector.broadcast %cst_134 : f32 to vector<8x256xf32>
    %379 = arith.subf %378, %375 : vector<8x256xf32>
    %380 = arith.select %377, %375, %379 : vector<8x256xi1>, vector<8x256xf32>
    %c9_135 = arith.constant 9 : index
    %c0_136 = arith.constant 0 : index
    %c0_137 = arith.constant 0 : index
    %381 = vector.load %arg4[%c9_135, %c0_136, %c0_137] : memref<16x8x256xf32, #tpu.memory_space<vmem>>, vector<1x8x256xf32>
    %382 = vector.shape_cast %381 : vector<1x8x256xf32> to vector<8x256xf32>
    %383 = vector.shape_cast %380 : vector<8x256xf32> to vector<1x8x256xf32>
    tpu.vector_store %arg4[%c9_135, %c0_136, %c0_137], %383 {strides = array<i32>} : memref<16x8x256xf32, #tpu.memory_space<vmem>>, vector<1x8x256xf32>,
    %c10_138 = arith.constant 10 : index
    %c0_139 = arith.constant 0 : index
    %c0_140 = arith.constant 0 : index
    %384 = vector.load %arg1[%c10_138, %c0_139, %c0_140] : memref<16x8x256xf32, #tpu.memory_space<vmem>>, vector<1x8x256xf32>
    %385 = vector.shape_cast %384 : vector<1x8x256xf32> to vector<8x256xf32>
    %386 = math.absf %385 : vector<8x256xf32>
    %387 = arith.subf %386, %243 : vector<8x256xf32>
    %cst_141 = arith.constant 0.000000e+00 : f32
    %388 = vector.broadcast %cst_141 : f32 to vector<8x256xf32>
    %389 = arith.maximumf %387, %388 : vector<8x256xf32>
    %cst_142 = arith.constant 0.000000e+00 : f32
    %390 = vector.broadcast %cst_142 : f32 to vector<8x256xf32>
    %391 = arith.cmpf oge, %385, %390 : vector<8x256xf32>
    %cst_143 = arith.constant 0.000000e+00 : f32
    %392 = vector.broadcast %cst_143 : f32 to vector<8x256xf32>
    %393 = arith.subf %392, %389 : vector<8x256xf32>
    %394 = arith.select %391, %389, %393 : vector<8x256xi1>, vector<8x256xf32>
    %c10_144 = arith.constant 10 : index
    %c0_145 = arith.constant 0 : index
    %c0_146 = arith.constant 0 : index
    %395 = vector.load %arg4[%c10_144, %c0_145, %c0_146] : memref<16x8x256xf32, #tpu.memory_space<vmem>>, vector<1x8x256xf32>
    %396 = vector.shape_cast %395 : vector<1x8x256xf32> to vector<8x256xf32>
    %397 = vector.shape_cast %394 : vector<8x256xf32> to vector<1x8x256xf32>
    tpu.vector_store %arg4[%c10_144, %c0_145, %c0_146], %397 {strides = array<i32>} : memref<16x8x256xf32, #tpu.memory_space<vmem>>, vector<1x8x256xf32>,
    %c11_147 = arith.constant 11 : index
    %c0_148 = arith.constant 0 : index
    %c0_149 = arith.constant 0 : index
    %398 = vector.load %arg1[%c11_147, %c0_148, %c0_149] : memref<16x8x256xf32, #tpu.memory_space<vmem>>, vector<1x8x256xf32>
    %399 = vector.shape_cast %398 : vector<1x8x256xf32> to vector<8x256xf32>
    %400 = math.absf %399 : vector<8x256xf32>
    %401 = arith.subf %400, %243 : vector<8x256xf32>
    %cst_150 = arith.constant 0.000000e+00 : f32
    %402 = vector.broadcast %cst_150 : f32 to vector<8x256xf32>
    %403 = arith.maximumf %401, %402 : vector<8x256xf32>
    %cst_151 = arith.constant 0.000000e+00 : f32
    %404 = vector.broadcast %cst_151 : f32 to vector<8x256xf32>
    %405 = arith.cmpf oge, %399, %404 : vector<8x256xf32>
    %cst_152 = arith.constant 0.000000e+00 : f32
    %406 = vector.broadcast %cst_152 : f32 to vector<8x256xf32>
    %407 = arith.subf %406, %403 : vector<8x256xf32>
    %408 = arith.select %405, %403, %407 : vector<8x256xi1>, vector<8x256xf32>
    %c11_153 = arith.constant 11 : index
    %c0_154 = arith.constant 0 : index
    %c0_155 = arith.constant 0 : index
    %409 = vector.load %arg4[%c11_153, %c0_154, %c0_155] : memref<16x8x256xf32, #tpu.memory_space<vmem>>, vector<1x8x256xf32>
    %410 = vector.shape_cast %409 : vector<1x8x256xf32> to vector<8x256xf32>
    %411 = vector.shape_cast %408 : vector<8x256xf32> to vector<1x8x256xf32>
    tpu.vector_store %arg4[%c11_153, %c0_154, %c0_155], %411 {strides = array<i32>} : memref<16x8x256xf32, #tpu.memory_space<vmem>>, vector<1x8x256xf32>,
    %c12_156 = arith.constant 12 : index
    %c0_157 = arith.constant 0 : index
    %c0_158 = arith.constant 0 : index
    %412 = vector.load %arg1[%c12_156, %c0_157, %c0_158] : memref<16x8x256xf32, #tpu.memory_space<vmem>>, vector<1x8x256xf32>
    %413 = vector.shape_cast %412 : vector<1x8x256xf32> to vector<8x256xf32>
    %414 = math.absf %413 : vector<8x256xf32>
    %415 = arith.subf %414, %243 : vector<8x256xf32>
    %cst_159 = arith.constant 0.000000e+00 : f32
    %416 = vector.broadcast %cst_159 : f32 to vector<8x256xf32>
    %417 = arith.maximumf %415, %416 : vector<8x256xf32>
    %cst_160 = arith.constant 0.000000e+00 : f32
    %418 = vector.broadcast %cst_160 : f32 to vector<8x256xf32>
    %419 = arith.cmpf oge, %413, %418 : vector<8x256xf32>
    %cst_161 = arith.constant 0.000000e+00 : f32
    %420 = vector.broadcast %cst_161 : f32 to vector<8x256xf32>
    %421 = arith.subf %420, %417 : vector<8x256xf32>
    %422 = arith.select %419, %417, %421 : vector<8x256xi1>, vector<8x256xf32>
    %c12_162 = arith.constant 12 : index
    %c0_163 = arith.constant 0 : index
    %c0_164 = arith.constant 0 : index
    %423 = vector.load %arg4[%c12_162, %c0_163, %c0_164] : memref<16x8x256xf32, #tpu.memory_space<vmem>>, vector<1x8x256xf32>
    %424 = vector.shape_cast %423 : vector<1x8x256xf32> to vector<8x256xf32>
    %425 = vector.shape_cast %422 : vector<8x256xf32> to vector<1x8x256xf32>
    tpu.vector_store %arg4[%c12_162, %c0_163, %c0_164], %425 {strides = array<i32>} : memref<16x8x256xf32, #tpu.memory_space<vmem>>, vector<1x8x256xf32>,
    %c13_165 = arith.constant 13 : index
    %c0_166 = arith.constant 0 : index
    %c0_167 = arith.constant 0 : index
    %426 = vector.load %arg1[%c13_165, %c0_166, %c0_167] : memref<16x8x256xf32, #tpu.memory_space<vmem>>, vector<1x8x256xf32>
    %427 = vector.shape_cast %426 : vector<1x8x256xf32> to vector<8x256xf32>
    %428 = math.absf %427 : vector<8x256xf32>
    %429 = arith.subf %428, %243 : vector<8x256xf32>
    %cst_168 = arith.constant 0.000000e+00 : f32
    %430 = vector.broadcast %cst_168 : f32 to vector<8x256xf32>
    %431 = arith.maximumf %429, %430 : vector<8x256xf32>
    %cst_169 = arith.constant 0.000000e+00 : f32
    %432 = vector.broadcast %cst_169 : f32 to vector<8x256xf32>
    %433 = arith.cmpf oge, %427, %432 : vector<8x256xf32>
    %cst_170 = arith.constant 0.000000e+00 : f32
    %434 = vector.broadcast %cst_170 : f32 to vector<8x256xf32>
    %435 = arith.subf %434, %431 : vector<8x256xf32>
    %436 = arith.select %433, %431, %435 : vector<8x256xi1>, vector<8x256xf32>
    %c13_171 = arith.constant 13 : index
    %c0_172 = arith.constant 0 : index
    %c0_173 = arith.constant 0 : index
    %437 = vector.load %arg4[%c13_171, %c0_172, %c0_173] : memref<16x8x256xf32, #tpu.memory_space<vmem>>, vector<1x8x256xf32>
    %438 = vector.shape_cast %437 : vector<1x8x256xf32> to vector<8x256xf32>
    %439 = vector.shape_cast %436 : vector<8x256xf32> to vector<1x8x256xf32>
    tpu.vector_store %arg4[%c13_171, %c0_172, %c0_173], %439 {strides = array<i32>} : memref<16x8x256xf32, #tpu.memory_space<vmem>>, vector<1x8x256xf32>,
    %c14_174 = arith.constant 14 : index
    %c0_175 = arith.constant 0 : index
    %c0_176 = arith.constant 0 : index
    %440 = vector.load %arg1[%c14_174, %c0_175, %c0_176] : memref<16x8x256xf32, #tpu.memory_space<vmem>>, vector<1x8x256xf32>
    %441 = vector.shape_cast %440 : vector<1x8x256xf32> to vector<8x256xf32>
    %442 = math.absf %441 : vector<8x256xf32>
    %443 = arith.subf %442, %243 : vector<8x256xf32>
    %cst_177 = arith.constant 0.000000e+00 : f32
    %444 = vector.broadcast %cst_177 : f32 to vector<8x256xf32>
    %445 = arith.maximumf %443, %444 : vector<8x256xf32>
    %cst_178 = arith.constant 0.000000e+00 : f32
    %446 = vector.broadcast %cst_178 : f32 to vector<8x256xf32>
    %447 = arith.cmpf oge, %441, %446 : vector<8x256xf32>
    %cst_179 = arith.constant 0.000000e+00 : f32
    %448 = vector.broadcast %cst_179 : f32 to vector<8x256xf32>
    %449 = arith.subf %448, %445 : vector<8x256xf32>
    %450 = arith.select %447, %445, %449 : vector<8x256xi1>, vector<8x256xf32>
    %c14_180 = arith.constant 14 : index
    %c0_181 = arith.constant 0 : index
    %c0_182 = arith.constant 0 : index
    %451 = vector.load %arg4[%c14_180, %c0_181, %c0_182] : memref<16x8x256xf32, #tpu.memory_space<vmem>>, vector<1x8x256xf32>
    %452 = vector.shape_cast %451 : vector<1x8x256xf32> to vector<8x256xf32>
    %453 = vector.shape_cast %450 : vector<8x256xf32> to vector<1x8x256xf32>
    tpu.vector_store %arg4[%c14_180, %c0_181, %c0_182], %453 {strides = array<i32>} : memref<16x8x256xf32, #tpu.memory_space<vmem>>, vector<1x8x256xf32>,
    %c15_183 = arith.constant 15 : index
    %c0_184 = arith.constant 0 : index
    %c0_185 = arith.constant 0 : index
    %454 = vector.load %arg1[%c15_183, %c0_184, %c0_185] : memref<16x8x256xf32, #tpu.memory_space<vmem>>, vector<1x8x256xf32>
    %455 = vector.shape_cast %454 : vector<1x8x256xf32> to vector<8x256xf32>
    %456 = math.absf %455 : vector<8x256xf32>
    %457 = arith.subf %456, %243 : vector<8x256xf32>
    %cst_186 = arith.constant 0.000000e+00 : f32
    %458 = vector.broadcast %cst_186 : f32 to vector<8x256xf32>
    %459 = arith.maximumf %457, %458 : vector<8x256xf32>
    %cst_187 = arith.constant 0.000000e+00 : f32
    %460 = vector.broadcast %cst_187 : f32 to vector<8x256xf32>
    %461 = arith.cmpf oge, %455, %460 : vector<8x256xf32>
    %cst_188 = arith.constant 0.000000e+00 : f32
    %462 = vector.broadcast %cst_188 : f32 to vector<8x256xf32>
    %463 = arith.subf %462, %459 : vector<8x256xf32>
    %464 = arith.select %461, %459, %463 : vector<8x256xi1>, vector<8x256xf32>
    %c15_189 = arith.constant 15 : index
    %c0_190 = arith.constant 0 : index
    %c0_191 = arith.constant 0 : index
    %465 = vector.load %arg4[%c15_189, %c0_190, %c0_191] : memref<16x8x256xf32, #tpu.memory_space<vmem>>, vector<1x8x256xf32>
    %466 = vector.shape_cast %465 : vector<1x8x256xf32> to vector<8x256xf32>
    %467 = vector.shape_cast %464 : vector<8x256xf32> to vector<1x8x256xf32>
    tpu.vector_store %arg4[%c15_189, %c0_190, %c0_191], %467 {strides = array<i32>} : memref<16x8x256xf32, #tpu.memory_space<vmem>>, vector<1x8x256xf32>,
    return
  }
  func.func @transform_0(%arg0: i32) -> (i32, i32, i32) {
    %c0_i32 = arith.constant 0 : i32
    %c0_i32_0 = arith.constant 0 : i32
    %c0_i32_1 = arith.constant 0 : i32
    return %c0_i32, %c0_i32_0, %arg0 : i32, i32, i32
  }
  func.func @transform_1(%arg0: i32) -> (i32, i32, i32) {
    %c0_i32 = arith.constant 0 : i32
    %c0_i32_0 = arith.constant 0 : i32
    %c0_i32_1 = arith.constant 0 : i32
    %c0_i32_2 = arith.constant 0 : i32
    return %c0_i32, %c0_i32_0, %c0_i32_1 : i32, i32, i32
  }
  func.func @transform_2(%arg0: i32) -> (i32, i32, i32) {
    %c0_i32 = arith.constant 0 : i32
    %c0_i32_0 = arith.constant 0 : i32
    %c0_i32_1 = arith.constant 0 : i32
    %c0_i32_2 = arith.constant 0 : i32
    return %c0_i32, %c0_i32_0, %c0_i32_1 : i32, i32, i32
  }
  func.func @transform_3(%arg0: i32) -> (i32, i32, i32) {
    %c0_i32 = arith.constant 0 : i32
    %c0_i32_0 = arith.constant 0 : i32
    %c0_i32_1 = arith.constant 0 : i32
    return %c0_i32, %c0_i32_0, %arg0 : i32, i32, i32
  }
}

</mosaic_0001>

<bundles_post_ra>
// kernel: tpu_custom_call.1
= control target key start
LH: loop header
LB: loop body
LE: loop exit
PB: predicated region body
PF: predicated region fallthrough
CT: control target
= control target key end

     0   :  { %8 = vsyncpa [#allocation3], 0  ;;  %s1506_s0 = inlined_call_operand.hbm [shape: f32[16,8,256], index: 0, kind: input, shape index: {}]   ;;  %s1507_s1 = inlined_call_operand.vmem [shape: f32[2,8,8], index: 1, kind: input, shape index: {}]   ;;  %s1508_s2 = inlined_call_operand.vmem [shape: f32[2,8,1], index: 2, kind: input, shape index: {}]   ;;  %s1509_s3 = inlined_call_operand.hbm [shape: f32[16,8,256], index: 3, kind: output, shape index: {}]  }
   0x1   :  { %9 = vsyncpa [#allocation4], 0  ;;  %s989_s12 = smov [#allocation2]   ;;  %s941_s16 = scalar_lea.hbm %s1506_s0, 4096 }
   0x2   :  { %s15_s13 = sshll.u32 %s989_s12, 4  ;;  %p942_p0 = scmp.ne.s32.totalorder %s1506_s0, %s941_s16  ;;  %s16_s13 = int_to_ptr.vmem [resolvable:$true] %s15_s13 }
   0x3   :  { %p945_p1 = scmp.lt.u32.totalorder %s941_s16, %s1506_s0 }
   0x5   :  { %p947_p2 = pnand %p945_p1, %p942_p0 }
   0x7   :  { %950 = shalt.err (!%p947_p2)
}
   0x8   :  { %s951_s21 = scalar_lea.vmem %s16_s13, 4096  ;;  %p956_p4 = scmp.lt.s32.totalorder %s16_s13, %s16_s13 }
   0x9   :  { %p952_p3 = scmp.ne.s32.totalorder %s16_s13, %s951_s21  ;;  %p957_p5 = scmp.lt.s32.totalorder %s951_s21, %s951_s21 }
   0xb   :  { %p958_p6 = por %p957_p5, %p956_p4 }
   0xd   :  { %p959_p7 = pnand %p958_p6, %p952_p3 }
   0xf   :  { %962 = shalt.err (!%p959_p7)
}
  0x10   :  { %s990_s22 = smov 256   ;;  %s991_s23 = smov 16  }
  0x11   :  { %21 = dma.hbm_to_vmem [thread:$0]  %s1506_s0, 4096, %s16_s13, [#allocation3], %s990_s22, %s990_s22, %s991_s23  }
  0x12   :  { %985 = dma.done.wait [#allocation3], 4096  }
  0x13   :  { %986 = vsyncadd [#allocation3], 4294963200  ;;  %v992_v0 = vmov 0.0   ;;  %v993_v1 = vmov 0   ;;  %v36_v2 = vld [vmem:[#allocation2 + $0x8] sm:$0xff]  ;;  %v41_v3 = vld [vmem:[#allocation2 + $0x18] sm:$0xff] }
  0x14   :  { %219 = vmatprep.mubr.f32.mxu0 %v992_v0  ;;  %931 = vset.pattern.permute.xlu0 %v993_v1  ;;  %v46_v4 = vld [vmem:[#allocation2 + $0x28] sm:$0xff]  ;;  %v1030_v5 = vand.u32 2147483647, %v36_v2  ;;  %v43_v6 = vand.u32 2147483647, %v41_v3  ;;  %v51_v8 = vld [vmem:[#allocation2 + $0x38] sm:$0xff] }
  0x15   :  { %300 = vmatprep.mubr.f32.mxu1 %v992_v0  ;;  %v48_v7 = vand.u32 2147483647, %v46_v4  ;;  %v56_v9 = vld [vmem:[#allocation2 + $0x48] sm:$0xff]  ;;  %v61_v10 = vld [vmem:[#allocation2 + $0x58] sm:$0xff]  ;;  %v53_v11 = vand.u32 2147483647, %v51_v8 }
  0x16   :  { %1529 = vst [vmem:[#allocation8_spill] sm:$0xff] %v1030_v5  ;;  %v115_v12 = vadd.f32 %v43_v6, %v1030_v5  ;;  %v66_v13 = vld [vmem:[#allocation2 + $0x68] sm:$0xff]  ;;  %v71_v14 = vld [vmem:[#allocation2 + $0x78] sm:$0xff]  ;;  %v58_v16 = vand.u32 2147483647, %v56_v9  ;;  %v32_v3 = vld [vmem:[%s1508_s2] sm:$0xff] }
  0x17   :  { %v76_v15 = vld [vmem:[#allocation2 + $0x88] sm:$0xff]  ;;  %v63_v17 = vand.u32 2147483647, %v61_v10  ;;  %v68_v18 = vand.u32 2147483647, %v66_v13  ;;  %v81_v21 = vld [vmem:[#allocation2 + $0x98] sm:$0xff]  ;;  %148 = vperm.xlu0 %931, %v32_v3  }
  0x18   :  { %v117_v19 = vadd.f32 %v115_v12, %v48_v7  ;;  %v78_v20 = vand.u32 2147483647, %v76_v15  ;;  %v86_v22 = vld [vmem:[#allocation2 + $0xa8] sm:$0xff]  ;;  %v91_v23 = vld [vmem:[#allocation2 + $0xb8] sm:$0xff]  ;;  %v73_v24 = vand.u32 2147483647, %v71_v14 }
  0x19   :  { %v83_v25 = vand.u32 2147483647, %v81_v21  ;;  %v88_v26 = vand.u32 2147483647, %v86_v22  ;;  %v1033_v28 = vand.u32 2147483647, %v91_v23 }
  0x1a   :  { %v119_v27 = vadd.f32 %v117_v19, %v53_v11  ;;  %v96_v29 = vld [vmem:[#allocation2 + $0xc8] sm:$0xff]  ;;  %v101_v30 = vld [vmem:[#allocation2 + $0xd8] sm:$0xff]  ;;  %v320_v32 = vmin.f32 %v1030_v5, %v78_v20  ;;  %v322_v33 = vmax.f32 %v1030_v5, %v78_v20  ;;  %vm151_vm0 = vcmask 64512  }
  0x1b   :  { %v106_v31 = vld [vmem:[#allocation2 + $0xe8] sm:$0xff]  ;;  %v1037_v34 = vand.u32 2147483647, %v96_v29  ;;  %v1039_v35 = vand.u32 2147483647, %v101_v30  ;;  %v111_v38 = vld [vmem:[#allocation2 + $0xf8] sm:$0xff]  ;;  %v324_v39 = vmin.f32 %v43_v6, %v83_v25  ;;  %v326_v40 = vmax.f32 %v43_v6, %v83_v25 }
  0x1c   :  { %v1041_v36 = vand.u32 2147483647, %v106_v31  ;;  %v121_v37 = vadd.f32 %v119_v27, %v58_v16  ;;  %v328_v41 = vmin.f32 %v48_v7, %v88_v26  ;;  %v330_v42 = vmax.f32 %v48_v7, %v88_v26  ;;  %v920_v13 = vld [vmem:[%s1508_s2 + $0x8] sm:$0xff] }
  0x1d   :  { %v1043_v43 = vand.u32 2147483647, %v111_v38  ;;  %v332_v45 = vmin.f32 %v53_v11, %v1033_v28  ;;  %v334_v46 = vmax.f32 %v53_v11, %v1033_v28  ;;  %v336_v47 = vmin.f32 %v58_v16, %v1037_v34  ;;  %230 = vperm.xlu0 %931, %v920_v13  }
  0x1e   :  { %v123_v44 = vadd.f32 %v121_v37, %v63_v17  ;;  %v338_v48 = vmax.f32 %v58_v16, %v1037_v34  ;;  %v340_v49 = vmin.f32 %v63_v17, %v1039_v35  ;;  %v342_v50 = vmax.f32 %v63_v17, %v1039_v35 }
  0x1f   :  { %v344_v52 = vmin.f32 %v68_v18, %v1041_v36  ;;  %v346_v53 = vmax.f32 %v68_v18, %v1041_v36  ;;  %v348_v54 = vmin.f32 %v73_v24, %v1043_v43  ;;  %v350_v55 = vmax.f32 %v73_v24, %v1043_v43 }
  0x20   :  { %v125_v51 = vadd.f32 %v123_v44, %v68_v18  ;;  %v352_v56 = vmin.f32 %v320_v32, %v336_v47  ;;  %v354_v57 = vmax.f32 %v320_v32, %v336_v47  ;;  %v356_v58 = vmin.f32 %v324_v39, %v340_v49 }
  0x21   :  { %v358_v60 = vmax.f32 %v324_v39, %v340_v49  ;;  %v360_v61 = vmin.f32 %v328_v41, %v344_v52  ;;  %v362_v62 = vmax.f32 %v328_v41, %v344_v52  ;;  %v364_v63 = vmin.f32 %v332_v45, %v348_v54 }
  0x22   :  { %v127_v59 = vadd.f32 %v125_v51, %v73_v24  ;;  %v366_v0 = vmax.f32 %v332_v45, %v348_v54  ;;  %v368_v1 = vmin.f32 %v322_v33, %v338_v48  ;;  %v370_v2 = vmax.f32 %v322_v33, %v338_v48 }
  0x23   :  { %v372_v6 = vmin.f32 %v326_v40, %v342_v50  ;;  %v374_v7 = vmax.f32 %v326_v40, %v342_v50  ;;  %v376_v8 = vmin.f32 %v330_v42, %v346_v53  ;;  %v378_v9 = vmax.f32 %v330_v42, %v346_v53 }
  0x24   :  { %v129_v4 = vadd.f32 %v127_v59, %v78_v20  ;;  %v380_v10 = vmin.f32 %v334_v46, %v350_v55  ;;  %v382_v11 = vmax.f32 %v334_v46, %v350_v55  ;;  %v384_v12 = vmin.f32 %v354_v57, %v368_v1 }
  0x25   :  { %v386_v15 = vmax.f32 %v354_v57, %v368_v1  ;;  %v388_v16 = vmin.f32 %v358_v60, %v372_v6  ;;  %v390_v17 = vmax.f32 %v358_v60, %v372_v6  ;;  %v392_v18 = vmin.f32 %v362_v62, %v376_v8 }
  0x26   :  { %v131_v14 = vadd.f32 %v129_v4, %v83_v25  ;;  %v394_v19 = vmax.f32 %v362_v62, %v376_v8  ;;  %v396_v21 = vmin.f32 %v366_v0, %v380_v10  ;;  %v398_v20 = vmax.f32 %v366_v0, %v380_v10 }
  0x27   :  { %v1061_v23 = vmin.f32 %v352_v56, %v360_v61  ;;  %v402_v24 = vmax.f32 %v352_v56, %v360_v61  ;;  %v1063_v27 = vmin.f32 %v356_v58, %v364_v63  ;;  %v406_v29 = vmax.f32 %v356_v58, %v364_v63 }
  0x28   :  { %v133_v22 = vadd.f32 %v131_v14, %v88_v26  ;;  %v408_v30 = vmin.f32 %v384_v12, %v392_v18  ;;  %v410_v31 = vmax.f32 %v384_v12, %v392_v18  ;;  %v412_v32 = vmin.f32 %v388_v16, %v396_v21 }
  0x29   :  { %v414_v33 = vmax.f32 %v388_v16, %v396_v21  ;;  %v416_v37 = vmin.f32 %v386_v15, %v394_v19  ;;  %v418_v38 = vmax.f32 %v386_v15, %v394_v19  ;;  %v420_v39 = vmin.f32 %v390_v17, %v398_v20 }
  0x2a   :  { %v135_v25 = vadd.f32 %v133_v22, %v1033_v28  ;;  %v422_v40 = vmax.f32 %v390_v17, %v398_v20  ;;  %v424_v41 = vmin.f32 %v370_v2, %v378_v9  ;;  %v1066_v42 = vmax.f32 %v370_v2, %v378_v9 }
  0x2b   :  { %v428_v44 = vmin.f32 %v374_v7, %v382_v11  ;;  %v1069_v45 = vmax.f32 %v374_v7, %v382_v11  ;;  %v432_v46 = vmin.f32 %v402_v24, %v416_v37  ;;  %v434_v47 = vmax.f32 %v402_v24, %v416_v37 }
  0x2c   :  { %v137_v26 = vadd.f32 %v135_v25, %v1037_v34  ;;  %v436_v48 = vmin.f32 %v406_v29, %v420_v39  ;;  %v438_v49 = vmax.f32 %v406_v29, %v420_v39  ;;  %v440_v50 = vmin.f32 %v410_v31, %v424_v41 }
  0x2d   :  { %v442_v51 = vmax.f32 %v410_v31, %v424_v41  ;;  %v444_v52 = vmin.f32 %v414_v33, %v428_v44  ;;  %v446_v53 = vmax.f32 %v414_v33, %v428_v44  ;;  %v448_v54 = vmin.f32 %v432_v46, %v408_v30 }
  0x2e   :  { %v139_v28 = vadd.f32 %v137_v26, %v1039_v35  ;;  %v450_v55 = vmax.f32 %v432_v46, %v408_v30  ;;  %v452_v56 = vmin.f32 %v436_v48, %v412_v32  ;;  %v454_v57 = vmax.f32 %v436_v48, %v412_v32 }
  0x2f   :  { %v456_v34 = vmin.f32 %v440_v50, %v434_v47  ;;  %v458_v59 = vmax.f32 %v440_v50, %v434_v47  ;;  %v460_v60 = vmin.f32 %v444_v52, %v438_v49  ;;  %v462_v61 = vmax.f32 %v444_v52, %v438_v49 }
  0x30   :  { %v141_v58 = vadd.f32 %v139_v28, %v1041_v36  ;;  %v464_v62 = vmin.f32 %v418_v38, %v442_v51  ;;  %v466_v63 = vmax.f32 %v418_v38, %v442_v51  ;;  %v468_v0 = vmin.f32 %v422_v40, %v446_v53 }
  0x31   :  { %v470_v2 = vmax.f32 %v422_v40, %v446_v53  ;;  %v472_v35 = vmin.f32 %v1061_v23, %v1063_v27  ;;  %v474_v3 = vmax.f32 %v1061_v23, %v1063_v27  ;;  %v476_v4 = vmin.f32 %v448_v54, %v452_v56 }
  0x32   :  { %v143_v1 = vadd.f32 %v141_v58, %v1043_v43  ;;  %v478_v6 = vmax.f32 %v448_v54, %v452_v56  ;;  %v480_v7 = vmin.f32 %v450_v55, %v454_v57  ;;  %v482_v36 = vmax.f32 %v450_v55, %v454_v57 }
  0x33   :  { %v484_v9 = vmin.f32 %v456_v34, %v460_v60  ;;  %v486_v10 = vmax.f32 %v456_v34, %v460_v60  ;;  %v488_v11 = vmin.f32 %v458_v59, %v462_v61  ;;  %v490_v12 = vmax.f32 %v458_v59, %v462_v61 }
  0x34   :  { %v145_v8 = vmul.f32 0.0625, %v143_v1  ;;  %v492_v13 = vmin.f32 %v464_v62, %v468_v0  ;;  %v494_v14 = vmax.f32 %v464_v62, %v468_v0  ;;  %v496_v15 = vmin.f32 %v466_v63, %v470_v2 }
  0x35   :  { %v498_v43 = vmax.f32 %v466_v63, %v470_v2  ;;  %v500_v16 = vmin.f32 %v1066_v42, %v1069_v45  ;;  %v502_v17 = vmax.f32 %v1066_v42, %v1069_v45  ;;  %v504_v18 = vmin.f32 %v474_v3, %v488_v11  ;;  %v1094_v2 = vld [vmem:[#allocation2] sm:$0xff] }
  0x36   :  { %155 = vmatprep.subr.mxu0 %v145_v8  ;;  %v506_v19 = vmax.f32 %v474_v3, %v488_v11  ;;  %v508_v21 = vmin.f32 %v478_v6, %v492_v13  ;;  %v510_v20 = vmax.f32 %v478_v6, %v492_v13  ;;  %v512_v22 = vmin.f32 %v482_v36, %v496_v15  ;;  %v1096_v3 = vld [vmem:[#allocation2 + $0x10] sm:$0xff] }
  0x37   :  { %v514_v23 = vmax.f32 %v482_v36, %v496_v15  ;;  %v516_v24 = vmin.f32 %v486_v10, %v500_v16  ;;  %v518_v27 = vmax.f32 %v486_v10, %v500_v16  ;;  %v520_v29 = vmin.f32 %v504_v18, %v480_v7  ;;  %v1110_v15 = vld [vmem:[#allocation2 + $0x30] sm:$0xff] }
  0x38   :  { %v522_v30 = vmax.f32 %v504_v18, %v480_v7  ;;  %v524_v31 = vmin.f32 %v508_v21, %v484_v9  ;;  %v526_v32 = vmax.f32 %v508_v21, %v484_v9  ;;  %v528_v25 = vmin.f32 %v512_v22, %v506_v19  ;;  %v1102_v9 = vld [vmem:[#allocation2 + $0x20] sm:$0xff] }
  0x39   :  { %v530_v33 = vmax.f32 %v512_v22, %v506_v19  ;;  %v532_v37 = vmin.f32 %v516_v24, %v510_v20  ;;  %v534_v38 = vmax.f32 %v516_v24, %v510_v20  ;;  %v536_v39 = vmin.f32 %v490_v12, %v514_v23  ;;  %v1119_v18 = vld [vmem:[#allocation2 + $0x40] sm:$0xff]  ;;  %v1126_v20 = vld [vmem:[#allocation2 + $0x50] sm:$0xff] }
  0x3a   :  { %v538_v40 = vmax.f32 %v490_v12, %v514_v23  ;;  %v540_v41 = vmin.f32 %v494_v14, %v518_v27  ;;  %v542_v42 = vmax.f32 %v494_v14, %v518_v27  ;;  %v544_v26 = vmin.f32 %v520_v29, %v476_v4  ;;  %v1132_v24 = vld [vmem:[#allocation2 + $0x60] sm:$0xff] }
  0x3b   :  { %v546_v44 = vmax.f32 %v520_v29, %v476_v4  ;;  %v548_v45 = vmin.f32 %v524_v31, %v522_v30  ;;  %v550_v46 = vmax.f32 %v524_v31, %v522_v30  ;;  %v552_v47 = vmin.f32 %v528_v25, %v526_v32  ;;  %v1138_v30 = vld [vmem:[#allocation2 + $0x70] sm:$0xff] }
  0x3c   :  { %v554_v48 = vmax.f32 %v528_v25, %v526_v32  ;;  %v556_v49 = vmin.f32 %v532_v37, %v530_v33  ;;  %v558_v50 = vmax.f32 %v532_v37, %v530_v33  ;;  %v560_v28 = vmin.f32 %v536_v39, %v534_v38  ;;  %v1144_v25 = vld [vmem:[#allocation2 + $0x80] sm:$0xff] }
  0x3d   :  { %v562_v51 = vmax.f32 %v536_v39, %v534_v38  ;;  %v564_v52 = vmin.f32 %v540_v41, %v538_v40  ;;  %v566_v53 = vmax.f32 %v540_v41, %v538_v40  ;;  %v568_v54 = vmin.f32 %v498_v43, %v542_v42  ;;  %v1150_v38 = vld [vmem:[#allocation2 + $0x90] sm:$0xff]  ;;  %v1156_v41 = vld [vmem:[#allocation2 + $0xa0] sm:$0xff] }
  0x3e   :  { %v570_v55 = vmax.f32 %v498_v43, %v542_v42  ;;  %v572_v56 = vsub.f32 %v556_v49, %v472_v35  ;;  %v1082_v57 = vsub.f32 %v556_v49, %v544_v26  ;;  %v1084_v58 = vsub.f32 %v556_v49, %v546_v44  ;;  %v1162_v44 = vld [vmem:[#allocation2 + $0xb0] sm:$0xff] }
  0x3f   :  { %v578_v34 = vsub.f32 %v556_v49, %v548_v45  ;;  %v580_v59 = vsub.f32 %v556_v49, %v550_v46  ;;  %v1086_v60 = vsub.f32 %v556_v49, %v552_v47  ;;  %v1088_v61 = vsub.f32 %v556_v49, %v554_v48  ;;  %1532 = vst [vmem:[#allocation11_spill] sm:$0xff] %v1162_v44  ;;  %v1168_v47 = vld [vmem:[#allocation2 + $0xc0] sm:$0xff] }
  0x40   :  { %v586_v62 = vsub.f32 %v556_v49, %v556_v49  ;;  %v588_v63 = vsub.f32 %v558_v50, %v556_v49  ;;  %v1090_v0 = vsub.f32 %v560_v28, %v556_v49  ;;  %v1092_v1 = vsub.f32 %v562_v51, %v556_v49  ;;  %1534 = vst [vmem:[#allocation13_spill] sm:$0xff] %v1168_v47  ;;  %v1174_v50 = vld [vmem:[#allocation2 + $0xd0] sm:$0xff] }
  0x41   :  { %v594_v35 = vsub.f32 %v564_v52, %v556_v49  ;;  %v596_v4 = vsub.f32 %v566_v53, %v556_v49  ;;  %v1098_v6 = vsub.f32 %v568_v54, %v556_v49  ;;  %v1100_v7 = vsub.f32 %v570_v55, %v556_v49  ;;  %1536 = vst [vmem:[#allocation15_spill] sm:$0xff] %v1174_v50  ;;  %v1180_v52 = vld [vmem:[#allocation2 + $0xe0] sm:$0xff]  ;;  %v1186_v55 = vld [vmem:[#allocation2 + $0xf0] sm:$0xff] }
  0x42   :  { %v602_v36 = vsub.f32 %v502_v17, %v556_v49  ;;  %v604_v8 = vmin.f32 %v572_v56, %v588_v63  ;;  %v1105_v12 = vand.u32 2147483647, %v1094_v2  ;;  %v1108_v13 = vand.u32 2147483647, %v1096_v3  ;;  %1538 = vst [vmem:[#allocation17_spill] sm:$0xff] %v1180_v52  ;;  %1540 = vst [vmem:[#allocation19_spill] sm:$0xff] %v1186_v55 }
  0x43   :  { %v610_v10 = vmin.f32 %v578_v34, %v594_v35  ;;  %v612_v11 = vmin.f32 %v580_v59, %v596_v4  ;;  %v1115_v16 = vand.u32 2147483647, %v1102_v9  ;;  %v1122_v19 = vand.u32 2147483647, %v1110_v15 }
  0x44   :  { %v618_v14 = vmin.f32 %v586_v62, %v602_v36  ;;  %v114_v21 = vadd.f32 %v1108_v13, %v1105_v12  ;;  %v1129_v22 = vand.u32 2147483647, %v1119_v18  ;;  %v1135_v27 = vand.u32 2147483647, %v1126_v20  ;;  %v29_v36 = vld [vmem:[%s1507_s1] sm:$0xff] }
  0x45   :  { %v1112_v43 = vmax.f32 %v604_v8, %v612_v11  ;;  %v1141_v31 = vand.u32 2147483647, %v1132_v24  ;;  %v1147_v33 = vand.u32 2147483647, %v1138_v30  ;;  %v1153_v39 = vand.u32 2147483647, %v1144_v25 }
  0x46   :  { %v1117_v17 = vmax.f32 %v610_v10, %v618_v14  ;;  %v116_v23 = vadd.f32 %v114_v21, %v1115_v16  ;;  %v1159_v42 = vand.u32 2147483647, %v1150_v38  ;;  %v1165_v45 = vand.u32 2147483647, %v1156_v41 }
  0x47   :  { %1530 = vst [vmem:[#allocation9_spill] sm:$0xff] %v1153_v39  ;;  %v1171_v48 = vand.u32 2147483647, %v1162_v44  ;;  %v1177_v28 = vand.u32 2147483647, %v1168_v47  ;;  %vm639_vm1 = vcmp.ge.f32.partialorder %v1094_v2, 0.0 }
  0x48   :  { %v118_v29 = vadd.f32 %v116_v23, %v1122_v19  ;;  %1531 = vst [vmem:[#allocation10_spill] sm:$0xff] %v1159_v42  ;;  %1533 = vst [vmem:[#allocation12_spill] sm:$0xff] %v1165_v45  ;;  %v1183_v53 = vand.u32 2147483647, %v1174_v50  ;;  %v1189_v56 = vand.u32 2147483647, %v1180_v52 }
  0x49   :  { %1535 = vst [vmem:[#allocation14_spill] sm:$0xff] %v1171_v48  ;;  %1537 = vst [vmem:[#allocation16_spill] sm:$0xff] %v1177_v28  ;;  %v1193_v59 = vand.u32 2147483647, %v1186_v55  ;;  %vm655_vm2 = vcmp.ge.f32.partialorder %v1096_v3, 0.0  ;;  %vm672_vm3 = vcmp.ge.f32.partialorder %v1102_v9, 0.0 }
  0x4a   :  { %v120_v32 = vadd.f32 %v118_v29, %v1129_v22  ;;  %1539 = vst [vmem:[#allocation18_spill] sm:$0xff] %v1183_v53  ;;  %1541 = vst [vmem:[#allocation20_spill] sm:$0xff] %v1189_v56  ;;  %vm689_vm4 = vcmp.ge.f32.partialorder %v1110_v15, 0.0  ;;  %vm706_vm5 = vcmp.ge.f32.partialorder %v1119_v18, 0.0  ;;  %vm723_vm6 = vcmp.ge.f32.partialorder %v1126_v20, 0.0 }
  0x4b   :  { %1542 = vst [vmem:[#allocation21_spill] sm:$0xff] %v1193_v59  ;;  %vm740_vm7 = vcmp.ge.f32.partialorder %v1132_v24, 0.0  ;;  %vm757_vm8 = vcmp.ge.f32.partialorder %v1138_v30, 0.0  ;;  %vm774_vm9 = vcmp.ge.f32.partialorder %v1144_v25, 0.0  ;;  %vm791_vm10 = vcmp.ge.f32.partialorder %v1150_v38, 0.0 }
  0x4c   :  { %v122_v37 = vadd.f32 %v120_v32, %v1135_v27  ;;  %v919_v32 = vld [vmem:[%s1507_s1 + $0x8] sm:$0xff]  ;;  %vm808_vm11 = vcmp.ge.f32.partialorder %v1156_v41, 0.0  ;;  %s994_s1 = smov [#allocation5]  }
  0x4d   :  { %s907_s5 = sshll.u32 %s994_s1, 4  ;;  %s908_s5 = int_to_ptr.vmem [resolvable:$true] %s907_s5 }
  0x4e   :  { %v124_v40 = vadd.f32 %v122_v37, %v1141_v31  ;;  %v606_v37 = vmin.f32 %v1082_v57, %v1090_v0  ;;  %v319_v57 = vmin.f32 %v1105_v12, %v1153_v39  ;;  %v327_v0 = vmin.f32 %v1115_v16, %v1165_v45  ;;  %v1548_v15 = vld [vmem:[#allocation9_spill] sm:$0xff]  ;;  %s963_s6 = scalar_lea.vmem %s908_s5, 4096  ;;  %p968_p9 = scmp.lt.s32.totalorder %s908_s5, %s908_s5 }
  0x4f   :  { %p964_p8 = scmp.ne.s32.totalorder %s908_s5, %s963_s6  ;;  %p969_p10 = scmp.lt.s32.totalorder %s963_s6, %s963_s6 }
  0x50   :  { %v126_v26 = vadd.f32 %v124_v40, %v1147_v33  ;;  %v608_v40 = vmin.f32 %v1084_v58, %v1092_v1  ;;  %v321_v58 = vmax.f32 %v1105_v12, %v1153_v39  ;;  %v329_v1 = vmax.f32 %v1115_v16, %v1165_v45 }
  0x51   :  { %p970_p11 = por %p969_p10, %p968_p9 }
  0x52   :  { %v128_v46 = vadd.f32 %v126_v26, %v1153_v39  ;;  %v614_v26 = vmin.f32 %v1086_v60, %v1098_v6  ;;  %v323_v60 = vmin.f32 %v1108_v13, %v1159_v42  ;;  %v331_v6 = vmin.f32 %v1122_v19, %v1171_v48 }
  0x53   :  { %p971_p12 = pnand %p970_p11, %p964_p8 }
  0x54   :  { %v130_v49 = vadd.f32 %v128_v46, %v1159_v42  ;;  %v616_v46 = vmin.f32 %v1088_v61, %v1100_v7  ;;  %v325_v61 = vmax.f32 %v1108_v13, %v1159_v42  ;;  %v333_v7 = vmax.f32 %v1122_v19, %v1171_v48 }
  0x56   :  { %v132_v51 = vadd.f32 %v130_v49, %v1165_v45  ;;  %v622_v49 = vmax.f32 %v606_v37, %v614_v26 }
  0x58   :  { %v134_v54 = vadd.f32 %v132_v51, %v1171_v48  ;;  %v624_v51 = vmax.f32 %v608_v40, %v616_v46 }
  0x5a   :  { %v136_v34 = vadd.f32 %v134_v54, %v1177_v28  ;;  %v628_v54 = vmax.f32 %v1112_v43, %v624_v51  ;;  %v335_v43 = vmin.f32 %v1129_v22, %v1177_v28 }
  0x5c   :  { %v138_v62 = vadd.f32 %v136_v34, %v1183_v53  ;;  %v630_v34 = vmax.f32 %v622_v49, %v1117_v17  ;;  %v339_v17 = vmin.f32 %v1135_v27, %v1183_v53  ;;  %v351_v26 = vmin.f32 %v319_v57, %v335_v43 }
  0x5e   :  { %v140_v63 = vadd.f32 %v138_v62, %v1189_v56  ;;  %v1214_v62 = vmax.f32 %v628_v54, %v630_v34  ;;  %v355_v46 = vmin.f32 %v323_v60, %v339_v17 }
  0x60   :  { %v142_v35 = vadd.f32 %v140_v63, %v1193_v59  ;;  %v343_v63 = vmin.f32 %v1141_v31, %v1189_v56 }
  0x62   :  { %v144_v4 = vmul.f32 0.0625, %v142_v35  ;;  %v347_v35 = vmin.f32 %v1147_v33, %v1193_v59  ;;  %v359_v49 = vmin.f32 %v327_v0, %v343_v63 }
  0x64   :  { %156 = vmatpush1.msra.mxu0 %v144_v4  ;;  %v337_v4 = vmax.f32 %v1129_v22, %v1177_v28  ;;  %v363_v51 = vmin.f32 %v331_v6, %v347_v35  ;;  %v401_v52 = vmax.f32 %v351_v26, %v359_v49 }
  0x65   :  { %921 = vmatmul.mubr.msk.f32.vlgmr.msra.gmra.mrb[0].mxu0 %vm151_vm0, %v29_v36  ;;  %v341_v36 = vmax.f32 %v1135_v27, %v1183_v53 }
  0x66   :  { %v369_v54 = vmax.f32 %v321_v58, %v337_v4  ;;  %v405_v50 = vmax.f32 %v355_v46, %v363_v51 }
  0x67   :  { %v373_v34 = vmax.f32 %v325_v61, %v341_v36 }
  0x96   :  { %v149_v8 = vpop.permute.xlu0 %148 }
 0x138   :  { %v221_v10 = vpop.f32.mrb[0].mxu0 }
 0x139   :  { %v222_v11 = vadd.f32 %v221_v10, %v149_v8  ;;  %v223_v14 = vpop.f32.mrb[1].mxu0  ;;  %v349_v10 = vmax.f32 %v1147_v33, %v1193_v59 }
 0x13a   :  { %v224_v21 = vadd.f32 %v223_v14, %v149_v8  ;;  %v345_v8 = vmax.f32 %v1141_v31, %v1189_v56  ;;  %v357_v14 = vmax.f32 %v323_v60, %v339_v17 }
 0x13b   :  { %v226_v29 = vmax.f32 %v222_v11, 0.0  ;;  %v353_v11 = vmax.f32 %v319_v57, %v335_v43  ;;  %v379_v40 = vmin.f32 %v333_v7, %v349_v10  ;;  %v381_v53 = vmax.f32 %v333_v7, %v349_v10 }
 0x13c   :  { %v227_v23 = vmax.f32 %v224_v21, 0.0  ;;  %v361_v21 = vmax.f32 %v327_v0, %v343_v63  ;;  %v375_v37 = vmin.f32 %v329_v1, %v345_v8  ;;  %v377_v5 = vmax.f32 %v329_v1, %v345_v8 }
 0x13e   :  { %236 = vmatprep.subr.mxu1 %v227_v23  ;;  %v365_v23 = vmax.f32 %v331_v6, %v347_v35  ;;  %v393_v48 = vmax.f32 %v361_v21, %v375_v37  ;;  %v391_v39 = vmin.f32 %v361_v21, %v375_v37  ;;  %v423_v0 = vmin.f32 %v369_v54, %v377_v5 }
 0x13f   :  { %237 = vmatpush1.msra.mxu1 %v226_v29  ;;  %v367_v29 = vmin.f32 %v321_v58, %v337_v4  ;;  %v427_v6 = vmin.f32 %v373_v34, %v381_v53  ;;  %v1252_v21 = vmax.f32 %v369_v54, %v377_v5 }
 0x140   :  { %922 = vmatmul.mubr.msk.f32.vlgmr.msra.gmra.mrb[0].mxu1 %vm151_vm0, %v919_v32  ;;  %v371_v32 = vmin.f32 %v325_v61, %v341_v36  ;;  %v397_v59 = vmax.f32 %v365_v23, %v379_v40  ;;  %v395_v55 = vmin.f32 %v365_v23, %v379_v40  ;;  %v1254_v23 = vmax.f32 %v373_v34, %v381_v53 }
 0x141   :  { %v385_v56 = vmax.f32 %v353_v11, %v367_v29  ;;  %v383_v45 = vmin.f32 %v353_v11, %v367_v29  ;;  %v1248_v11 = vmin.f32 %v351_v26, %v359_v49 }
 0x142   :  { %v389_v28 = vmax.f32 %v357_v14, %v371_v32  ;;  %v387_v42 = vmin.f32 %v357_v14, %v371_v32  ;;  %v1250_v14 = vmin.f32 %v355_v46, %v363_v51  ;;  %v499_v46 = vmin.f32 %v1252_v21, %v1254_v23 }
 0x143   :  { %v415_v47 = vmin.f32 %v385_v56, %v393_v48  ;;  %v409_v57 = vmax.f32 %v383_v45, %v391_v39  ;;  %v407_v58 = vmin.f32 %v383_v45, %v391_v39  ;;  %v417_v4 = vmax.f32 %v385_v56, %v393_v48 }
 0x144   :  { %v419_v44 = vmin.f32 %v389_v28, %v397_v59  ;;  %v413_v60 = vmax.f32 %v387_v42, %v395_v55  ;;  %v411_v61 = vmin.f32 %v387_v42, %v395_v55  ;;  %v421_v36 = vmax.f32 %v389_v28, %v397_v59 }
 0x145   :  { %v431_v1 = vmin.f32 %v401_v52, %v415_v47  ;;  %v433_v43 = vmax.f32 %v401_v52, %v415_v47  ;;  %v439_v63 = vmin.f32 %v409_v57, %v423_v0  ;;  %v441_v8 = vmax.f32 %v409_v57, %v423_v0 }
 0x146   :  { %v435_v7 = vmin.f32 %v405_v50, %v419_v44  ;;  %v437_v17 = vmax.f32 %v405_v50, %v419_v44  ;;  %v443_v35 = vmin.f32 %v413_v60, %v427_v6  ;;  %v445_v10 = vmax.f32 %v413_v60, %v427_v6 }
 0x147   :  { %v447_v39 = vmin.f32 %v431_v1, %v407_v58  ;;  %v449_v42 = vmax.f32 %v431_v1, %v407_v58  ;;  %v455_v47 = vmin.f32 %v439_v63, %v433_v43  ;;  %v457_v44 = vmax.f32 %v439_v63, %v433_v43 }
 0x148   :  { %v451_v45 = vmin.f32 %v435_v7, %v411_v61  ;;  %v453_v55 = vmax.f32 %v435_v7, %v411_v61  ;;  %v459_v50 = vmin.f32 %v443_v35, %v437_v17  ;;  %v461_v52 = vmax.f32 %v443_v35, %v437_v17 }
 0x149   :  { %v463_v48 = vmin.f32 %v417_v4, %v441_v8  ;;  %v465_v28 = vmax.f32 %v417_v4, %v441_v8  ;;  %v467_v56 = vmin.f32 %v421_v36, %v445_v10  ;;  %v469_v59 = vmax.f32 %v421_v36, %v445_v10 }
 0x14a   :  { %v473_v29 = vmax.f32 %v1248_v11, %v1250_v14  ;;  %v477_v32 = vmax.f32 %v447_v39, %v451_v45  ;;  %v481_v5 = vmax.f32 %v449_v42, %v453_v55  ;;  %v487_v37 = vmin.f32 %v457_v44, %v461_v52 }
 0x14b   :  { %v485_v53 = vmax.f32 %v455_v47, %v459_v50  ;;  %v491_v40 = vmin.f32 %v463_v48, %v467_v56  ;;  %v495_v26 = vmin.f32 %v465_v28, %v469_v59  ;;  %v479_v49 = vmin.f32 %v449_v42, %v453_v55 }
 0x14c   :  { %v503_v51 = vmin.f32 %v473_v29, %v487_v37  ;;  %v505_v54 = vmax.f32 %v473_v29, %v487_v37  ;;  %v483_v0 = vmin.f32 %v455_v47, %v459_v50  ;;  %v489_v58 = vmax.f32 %v457_v44, %v461_v52 }
 0x14d   :  { %v509_v34 = vmax.f32 %v477_v32, %v491_v40  ;;  %v511_v57 = vmin.f32 %v481_v5, %v495_v26  ;;  %v515_v60 = vmin.f32 %v485_v53, %v499_v46  ;;  %v507_v6 = vmin.f32 %v477_v32, %v491_v40 }
 0x14e   :  { %v513_v61 = vmax.f32 %v481_v5, %v495_v26  ;;  %v493_v1 = vmax.f32 %v463_v48, %v467_v56  ;;  %v517_v7 = vmax.f32 %v485_v53, %v499_v46  ;;  %v475_v43 = vmin.f32 %v447_v39, %v451_v45  ;;  %v231_v39 = vpop.permute.xlu0 %230 }
 0x14f   :  { %v519_v17 = vmin.f32 %v503_v51, %v479_v49  ;;  %v529_v63 = vmax.f32 %v511_v57, %v505_v54  ;;  %v531_v35 = vmin.f32 %v515_v60, %v509_v34  ;;  %v521_v4 = vmax.f32 %v503_v51, %v479_v49 }
 0x150   :  { %v523_v36 = vmin.f32 %v507_v6, %v483_v0  ;;  %v525_v8 = vmax.f32 %v507_v6, %v483_v0  ;;  %v527_v10 = vmin.f32 %v511_v57, %v505_v54  ;;  %v471_v42 = vmin.f32 %v1248_v11, %v1250_v14 }
 0x151   :  { %v497_v55 = vmax.f32 %v465_v28, %v469_v59  ;;  %v533_v29 = vmax.f32 %v515_v60, %v509_v34  ;;  %v535_v37 = vmin.f32 %v489_v58, %v513_v61  ;;  %v501_v47 = vmax.f32 %v1252_v21, %v1254_v23 }
 0x152   :  { %v537_v44 = vmax.f32 %v489_v58, %v513_v61  ;;  %v539_v50 = vmin.f32 %v493_v1, %v517_v7  ;;  %v541_v52 = vmax.f32 %v493_v1, %v517_v7  ;;  %v543_v48 = vmin.f32 %v519_v17, %v475_v43 }
 0x153   :  { %v545_v56 = vmax.f32 %v519_v17, %v475_v43  ;;  %v555_v32 = vmin.f32 %v531_v35, %v529_v63  ;;  %v547_v40 = vmin.f32 %v523_v36, %v521_v4  ;;  %v549_v26 = vmax.f32 %v523_v36, %v521_v4 }
 0x154   :  { %v551_v46 = vmin.f32 %v527_v10, %v525_v8  ;;  %v553_v14 = vmax.f32 %v527_v10, %v525_v8  ;;  %v557_v28 = vmax.f32 %v531_v35, %v529_v63  ;;  %v559_v59 = vmin.f32 %v535_v37, %v533_v29 }
 0x155   :  { %v561_v51 = vmax.f32 %v535_v37, %v533_v29  ;;  %v563_v21 = vmin.f32 %v539_v50, %v537_v44  ;;  %v565_v23 = vmax.f32 %v539_v50, %v537_v44  ;;  %v567_v34 = vmin.f32 %v497_v55, %v541_v52 }
 0x156   :  { %v569_v57 = vmax.f32 %v497_v55, %v541_v52  ;;  %v571_v60 = vsub.f32 %v555_v32, %v471_v42  ;;  %v573_v0 = vsub.f32 %v555_v32, %v543_v48  ;;  %v575_v6 = vsub.f32 %v555_v32, %v545_v56 }
 0x157   :  { %v577_v58 = vsub.f32 %v555_v32, %v547_v40  ;;  %v579_v61 = vsub.f32 %v555_v32, %v549_v26  ;;  %v581_v1 = vsub.f32 %v555_v32, %v551_v46  ;;  %v583_v7 = vsub.f32 %v555_v32, %v553_v14 }
 0x158   :  { %v585_v43 = vsub.f32 %v555_v32, %v555_v32  ;;  %v587_v17 = vsub.f32 %v557_v28, %v555_v32  ;;  %v589_v63 = vsub.f32 %v559_v59, %v555_v32  ;;  %v595_v35 = vsub.f32 %v565_v23, %v555_v32  ;;  %v1266_v28 = vld [vmem:[#allocation2 + $0x28] sm:$0xff]  ;;  %v1268_v59 = vld [vmem:[#allocation2 + $0x38] sm:$0xff] }
 0x159   :  { %v601_v4 = vsub.f32 %v501_v47, %v555_v32  ;;  %v591_v36 = vsub.f32 %v561_v51, %v555_v32  ;;  %v593_v8 = vsub.f32 %v563_v21, %v555_v32  ;;  %v597_v10 = vsub.f32 %v567_v34, %v555_v32  ;;  %v1273_v21 = vld [vmem:[#allocation2 + $0x58] sm:$0xff]  ;;  %v1277_v34 = vld [vmem:[#allocation2 + $0x68] sm:$0xff] }
 0x15a   :  { %v599_v29 = vsub.f32 %v569_v57, %v555_v32  ;;  %v603_v37 = vmin.f32 %v571_v60, %v587_v17  ;;  %v605_v42 = vmin.f32 %v573_v0, %v589_v63  ;;  %v611_v44 = vmin.f32 %v579_v61, %v595_v35  ;;  %v1280_v0 = vld [vmem:[#allocation2 + $0x78] sm:$0xff]  ;;  %v1304_v35 = vld [vmem:[#allocation2 + $0xe8] sm:$0xff] }
 0x15b   :  { %v617_v55 = vmin.f32 %v585_v43, %v601_v4  ;;  %v607_v50 = vmin.f32 %v575_v6, %v591_v36  ;;  %v609_v52 = vmin.f32 %v577_v58, %v593_v8  ;;  %v667_v23 = vand.u32 2147483647, %v1266_v28  ;;  %v1282_v6 = vld [vmem:[#allocation2 + $0x88] sm:$0xff]  ;;  %v1284_v58 = vld [vmem:[#allocation2 + $0x98] sm:$0xff] }
 0x15c   :  { %v718_v61 = vand.u32 2147483647, %v1273_v21  ;;  %v1295_v43 = vld [vmem:[#allocation2 + $0xc8] sm:$0xff]  ;;  %v735_v17 = vand.u32 2147483647, %v1277_v34  ;;  %v1302_v63 = vld [vmem:[#allocation2 + $0xd8] sm:$0xff] }
 0x15d   :  { %v625_v46 = vmax.f32 %v609_v52, %v617_v55  ;;  %v1306_v4 = vld [vmem:[#allocation2 + $0xf8] sm:$0xff]  ;;  %v752_v8 = vand.u32 2147483647, %v1280_v0 }
 0x213   :  { %v302_v45 = vpop.f32.mrb[0].mxu1 }
 0x214   :  { %v303_v5 = vadd.f32 %v302_v45, %v231_v39  ;;  %v304_v53 = vpop.f32.mrb[1].mxu1  ;;  %v615_v45 = vmin.f32 %v583_v7, %v599_v29  ;;  %v1293_v7 = vld [vmem:[#allocation2 + $0xb8] sm:$0xff]  ;;  %v786_v29 = vand.u32 2147483647, %v1284_v58 }
 0x215   :  { %v305_v11 = vadd.f32 %v304_v53, %v231_v39  ;;  %v613_v39 = vmin.f32 %v581_v1, %v597_v10  ;;  %v619_v53 = vmax.f32 %v603_v37, %v611_v44  ;;  %v1291_v1 = vld [vmem:[#allocation2 + $0xa8] sm:$0xff]  ;;  %v769_v10 = vand.u32 2147483647, %v1282_v6 }
 0x216   :  { %v923_v49 = vmul.f32 -1.442695, %v303_v5  ;;  %v623_v26 = vmax.f32 %v607_v50, %v615_v45 }
 0x217   :  { %v924_v54 = vmul.f32 -1.442695, %v305_v11  ;;  %v621_v40 = vmax.f32 %v605_v42, %v613_v39  ;;  %v1264_v11 = vld [vmem:[#allocation2 + $0x18] sm:$0xff]  ;;  %v803_v42 = vand.u32 2147483647, %v1291_v1 }
 0x218   :  { %932 = vpow2.f32 %v923_v49  ;;  %v627_v32 = vmax.f32 %v619_v53, %v623_v26  ;;  %v1270_v49 = vld [vmem:[#allocation2 + $0x48] sm:$0xff]  ;;  %v650_v51 = vand.u32 2147483647, %v1264_v11 }
 0x219   :  { %934 = vpow2.f32 %v924_v54  ;;  %v629_v14 = vmax.f32 %v621_v40, %v625_v46  ;;  %v684_v54 = vand.u32 2147483647, %v1268_v59  ;;  %v701_v60 = vand.u32 2147483647, %v1270_v49 }
 0x21b   :  { %v631_v57 = vmax.f32 %v627_v32, %v629_v14 }
 0x222   :  { %v933_v48 = vpop.eup %932 }
 0x223   :  { %v935_v56 = vpop.eup %934  ;;  %v313_v5 = vadd.f32 1.0, %v933_v48 }
 0x224   :  { %v314_v47 = vadd.f32 1.0, %v935_v56 }
 0x225   :  { %936 = vrcp.f32 %v313_v5 }
 0x226   :  { %938 = vrcp.f32 %v314_v47 }
 0x22f   :  { %v937_v36 = vpop.eup %936 }
 0x230   :  { %v939_v37 = vpop.eup %938  ;;  %v1311_v55 = vmul.f32 %v937_v36, %v631_v57 }
 0x231   :  { %v1317_v52 = vmul.f32 %v939_v37, %v1214_v62 }
 0x232   :  { %v635_v56 = vsub.f32 %v1105_v12, %v1311_v55  ;;  %v651_v5 = vsub.f32 %v1108_v13, %v1311_v55  ;;  %v668_v53 = vsub.f32 %v1115_v16, %v1311_v55  ;;  %v685_v40 = vsub.f32 %v1122_v19, %v1311_v55 }
 0x233   :  { %v702_v62 = vsub.f32 %v1129_v22, %v1311_v55  ;;  %v719_v26 = vsub.f32 %v1135_v27, %v1311_v55  ;;  %v736_v46 = vsub.f32 %v1141_v31, %v1311_v55  ;;  %v753_v12 = vsub.f32 %v1147_v33, %v1311_v55  ;;  %v1543_v22 = vld [vmem:[#allocation11_spill] sm:$0xff] }
 0x234   :  { %v637_v47 = vmax.f32 %v635_v56, 0.0  ;;  %v653_v13 = vmax.f32 %v651_v5, 0.0  ;;  %v670_v32 = vmax.f32 %v668_v53, 0.0  ;;  %v687_v14 = vmax.f32 %v685_v40, 0.0  ;;  %v1544_v56 = vld [vmem:[#allocation13_spill] sm:$0xff]  ;;  %v1545_v5 = vld [vmem:[#allocation15_spill] sm:$0xff] }
 0x235   :  { %v704_v16 = vmax.f32 %v702_v62, 0.0  ;;  %v721_v57 = vmax.f32 %v719_v26, 0.0  ;;  %v738_v36 = vmax.f32 %v736_v46, 0.0  ;;  %v755_v19 = vmax.f32 %v753_v12, 0.0  ;;  %v1546_v53 = vld [vmem:[#allocation17_spill] sm:$0xff]  ;;  %v1547_v40 = vld [vmem:[#allocation19_spill] sm:$0xff] }
 0x236   :  { %vm825_vm12 = vcmp.ge.f32.partialorder %v1543_v22, 0.0  ;;  %v641_v27 = vsub.f32 0.0, %v637_v47  ;;  %v657_v31 = vsub.f32 0.0, %v653_v13  ;;  %v674_v37 = vsub.f32 0.0, %v670_v32  ;;  %v1556_v22 = vld [vmem:[#allocation8_spill] sm:$0xff] }
 0x237   :  { %v691_v33 = vsub.f32 0.0, %v687_v14  ;;  %vm842_vm13 = vcmp.ge.f32.partialorder %v1544_v56, 0.0  ;;  %vm859_vm14 = vcmp.ge.f32.partialorder %v1545_v5, 0.0  ;;  %vm876_vm15 = vcmp.ge.f32.partialorder %v1546_v53, 0.0 }
 0x238   :  { %vm893_vm0 = vcmp.ge.f32.partialorder %v1547_v40, 0.0  ;;  %v708_v62 = vsub.f32 0.0, %v704_v16  ;;  %v725_v26 = vsub.f32 0.0, %v721_v57  ;;  %v742_v46 = vsub.f32 0.0, %v738_v36 }
 0x239   :  { %v759_v12 = vsub.f32 0.0, %v755_v19  ;;  %v643_v48 = vsel %vm639_vm1, %v637_v47, %v641_v27  ;;  %v659_v45 = vsel %vm655_vm2, %v653_v13, %v657_v31  ;;  %v676_v39 = vsel %vm672_vm3, %v670_v32, %v674_v37  ;;  %v1552_v47 = vld [vmem:[#allocation16_spill] sm:$0xff]  ;;  %v1378_v37 = vld [vmem:[#allocation2 + $0x8] sm:$0xff] }
 0x23a   :  { %v693_v50 = vsel %vm689_vm4, %v687_v14, %v691_v33  ;;  %645 = vst [vmem:[#allocation5] sm:$0xff] %v643_v48  ;;  %662 = vst [vmem:[#allocation5 + $0x10] sm:$0xff] %v659_v45  ;;  %v710_v44 = vsel %vm706_vm5, %v704_v16, %v708_v62  ;;  %v727_v2 = vsel %vm723_vm6, %v721_v57, %v725_v26  ;;  %v1550_v45 = vld [vmem:[#allocation12_spill] sm:$0xff]  ;;  %v1551_v48 = vld [vmem:[#allocation14_spill] sm:$0xff]  ;;  %vm640_vm1 = vcmp.ge.f32.partialorder %v1378_v37, 0.0 }
 0x23b   :  { %679 = vst [vmem:[#allocation5 + $0x20] sm:$0xff] %v676_v39  ;;  %696 = vst [vmem:[#allocation5 + $0x30] sm:$0xff] %v693_v50  ;;  %v744_v3 = vsel %vm740_vm7, %v738_v36, %v742_v46  ;;  %v761_v9 = vsel %vm757_vm8, %v755_v19, %v759_v12  ;;  %v770_v39 = vsub.f32 %v1548_v15, %v1311_v55  ;;  %v1549_v50 = vld [vmem:[#allocation10_spill] sm:$0xff]  ;;  %v1554_v32 = vld [vmem:[#allocation20_spill] sm:$0xff]  ;;  %vm656_vm2 = vcmp.ge.f32.partialorder %v1264_v11, 0.0 }
 0x23c   :  { %713 = vst [vmem:[#allocation5 + $0x40] sm:$0xff] %v710_v44  ;;  %730 = vst [vmem:[#allocation5 + $0x50] sm:$0xff] %v727_v2  ;;  %v787_v18 = vsub.f32 %v1549_v50, %v1311_v55  ;;  %v804_v20 = vsub.f32 %v1550_v45, %v1311_v55  ;;  %v821_v24 = vsub.f32 %v1551_v48, %v1311_v55  ;;  %v1553_v44 = vld [vmem:[#allocation18_spill] sm:$0xff]  ;;  %v1555_v16 = vld [vmem:[#allocation21_spill] sm:$0xff]  ;;  %vm673_vm3 = vcmp.ge.f32.partialorder %v1266_v28, 0.0 }
 0x23d   :  { %747 = vst [vmem:[#allocation5 + $0x60] sm:$0xff] %v744_v3  ;;  %764 = vst [vmem:[#allocation5 + $0x70] sm:$0xff] %v761_v9  ;;  %v838_v30 = vsub.f32 %v1552_v47, %v1311_v55  ;;  %v855_v13 = vsub.f32 %v1553_v44, %v1311_v55  ;;  %v872_v14 = vsub.f32 %v1554_v32, %v1311_v55  ;;  %v772_v36 = vmax.f32 %v770_v39, 0.0 }
 0x23e   :  { %v889_v57 = vsub.f32 %v1555_v16, %v1311_v55  ;;  %v789_v19 = vmax.f32 %v787_v18, 0.0  ;;  %v806_v27 = vmax.f32 %v804_v20, 0.0  ;;  %v823_v31 = vmax.f32 %v821_v24, 0.0 }
 0x23f   :  { %v840_v33 = vmax.f32 %v838_v30, 0.0  ;;  %v857_v62 = vmax.f32 %v855_v13, 0.0  ;;  %v874_v26 = vmax.f32 %v872_v14, 0.0  ;;  %vm690_vm4 = vcmp.ge.f32.partialorder %v1268_v59, 0.0 }
 0x240   :  { %v891_v46 = vmax.f32 %v889_v57, 0.0  ;;  %v776_v12 = vsub.f32 0.0, %v772_v36  ;;  %v793_v55 = vsub.f32 0.0, %v789_v19  ;;  %v810_v2 = vsub.f32 0.0, %v806_v27 }
 0x241   :  { %v827_v3 = vsub.f32 0.0, %v823_v31  ;;  %vm707_vm5 = vcmp.ge.f32.partialorder %v1270_v49, 0.0  ;;  %vm724_vm6 = vcmp.ge.f32.partialorder %v1273_v21, 0.0  ;;  %vm741_vm7 = vcmp.ge.f32.partialorder %v1277_v34, 0.0 }
 0x242   :  { %vm758_vm8 = vcmp.ge.f32.partialorder %v1280_v0, 0.0  ;;  %v844_v9 = vsub.f32 0.0, %v840_v33  ;;  %v861_v15 = vsub.f32 0.0, %v857_v62  ;;  %v878_v39 = vsub.f32 0.0, %v874_v26 }
 0x243   :  { %v895_v50 = vsub.f32 0.0, %v891_v46  ;;  %v778_v18 = vsel %vm774_vm9, %v772_v36, %v776_v12  ;;  %v795_v45 = vsel %vm791_vm10, %v789_v19, %v793_v55  ;;  %v812_v20 = vsel %vm808_vm11, %v806_v27, %v810_v2 }
 0x244   :  { %v829_v48 = vsel %vm825_vm12, %v823_v31, %v827_v3  ;;  %781 = vst [vmem:[#allocation5 + $0x80] sm:$0xff] %v778_v18  ;;  %798 = vst [vmem:[#allocation5 + $0x90] sm:$0xff] %v795_v45  ;;  %v846_v24 = vsel %vm842_vm13, %v840_v33, %v844_v9  ;;  %v863_v25 = vsel %vm859_vm14, %v857_v62, %v861_v15  ;;  %vm775_vm9 = vcmp.ge.f32.partialorder %v1282_v6, 0.0 }
 0x245   :  { %815 = vst [vmem:[#allocation5 + $0xa0] sm:$0xff] %v812_v20  ;;  %832 = vst [vmem:[#allocation5 + $0xb0] sm:$0xff] %v829_v48  ;;  %v880_v38 = vsel %vm876_vm15, %v874_v26, %v878_v39  ;;  %v897_v41 = vsel %vm893_vm0, %v891_v46, %v895_v50  ;;  %v636_v47 = vsub.f32 %v1556_v22, %v1317_v52  ;;  %vm792_vm10 = vcmp.ge.f32.partialorder %v1284_v58, 0.0 }
 0x246   :  { %849 = vst [vmem:[#allocation5 + $0xc0] sm:$0xff] %v846_v24  ;;  %866 = vst [vmem:[#allocation5 + $0xd0] sm:$0xff] %v863_v25  ;;  %v652_v56 = vsub.f32 %v650_v51, %v1317_v52  ;;  %v669_v5 = vsub.f32 %v667_v23, %v1317_v52  ;;  %v686_v53 = vsub.f32 %v684_v54, %v1317_v52  ;;  %vm809_vm11 = vcmp.ge.f32.partialorder %v1291_v1, 0.0 }
 0x247   :  { %883 = vst [vmem:[#allocation5 + $0xe0] sm:$0xff] %v880_v38  ;;  %900 = vst [vmem:[#allocation5 + $0xf0] sm:$0xff] %v897_v41  ;;  %v703_v40 = vsub.f32 %v701_v60, %v1317_v52  ;;  %v720_v30 = vsub.f32 %v718_v61, %v1317_v52  ;;  %v737_v51 = vsub.f32 %v735_v17, %v1317_v52  ;;  %v638_v44 = vmax.f32 %v636_v47, 0.0 }
 0x248   :  { %v754_v23 = vsub.f32 %v752_v8, %v1317_v52  ;;  %v654_v13 = vmax.f32 %v652_v56, 0.0  ;;  %v671_v32 = vmax.f32 %v669_v5, 0.0  ;;  %v688_v54 = vmax.f32 %v686_v53, 0.0 }
 0x249   :  { %v705_v14 = vmax.f32 %v703_v40, 0.0  ;;  %v722_v16 = vmax.f32 %v720_v30, 0.0  ;;  %v739_v57 = vmax.f32 %v737_v51, 0.0  ;;  %vm826_vm12 = vcmp.ge.f32.partialorder %v1293_v7, 0.0 }
 0x24a   :  { %v756_v60 = vmax.f32 %v754_v23, 0.0  ;;  %v642_v61 = vsub.f32 0.0, %v638_v44  ;;  %v658_v17 = vsub.f32 0.0, %v654_v13  ;;  %v675_v36 = vsub.f32 0.0, %v671_v32 }
 0x24b   :  { %v692_v8 = vsub.f32 0.0, %v688_v54  ;;  %vm843_vm13 = vcmp.ge.f32.partialorder %v1295_v43, 0.0  ;;  %vm860_vm14 = vcmp.ge.f32.partialorder %v1302_v63, 0.0  ;;  %vm877_vm15 = vcmp.ge.f32.partialorder %v1304_v35, 0.0 }
 0x24c   :  { %vm894_vm0 = vcmp.ge.f32.partialorder %v1306_v4, 0.0  ;;  %v709_v19 = vsub.f32 0.0, %v705_v14  ;;  %v726_v27 = vsub.f32 0.0, %v722_v16  ;;  %v743_v31 = vsub.f32 0.0, %v739_v57 }
 0x24d   :  { %v760_v33 = vsub.f32 0.0, %v756_v60  ;;  %v644_v62 = vsel %vm640_vm1, %v638_v44, %v642_v61  ;;  %v660_v26 = vsel %vm656_vm2, %v654_v13, %v658_v17  ;;  %v677_v46 = vsel %vm673_vm3, %v671_v32, %v675_v36 }
 0x24e   :  { %v694_v12 = vsel %vm690_vm4, %v688_v54, %v692_v8  ;;  %646 = vst [vmem:[#allocation5 + $0x8] sm:$0xff] %v644_v62  ;;  %663 = vst [vmem:[#allocation5 + $0x18] sm:$0xff] %v660_v26  ;;  %v711_v55 = vsel %vm707_vm5, %v705_v14, %v709_v19  ;;  %v728_v37 = vsel %vm724_vm6, %v722_v16, %v726_v27  ;;  %v1557_v34 = vand.u32 2147483647, %v1293_v7 }
 0x24f   :  { %680 = vst [vmem:[#allocation5 + $0x28] sm:$0xff] %v677_v46  ;;  %697 = vst [vmem:[#allocation5 + $0x38] sm:$0xff] %v694_v12  ;;  %v745_v11 = vsel %vm741_vm7, %v739_v57, %v743_v31  ;;  %v762_v28 = vsel %vm758_vm8, %v756_v60, %v760_v33  ;;  %v771_v59 = vsub.f32 %v769_v10, %v1317_v52  ;;  %v1558_v2 = vand.u32 2147483647, %v1295_v43 }
 0x250   :  { %714 = vst [vmem:[#allocation5 + $0x48] sm:$0xff] %v711_v55  ;;  %731 = vst [vmem:[#allocation5 + $0x58] sm:$0xff] %v728_v37  ;;  %v788_v49 = vsub.f32 %v786_v29, %v1317_v52  ;;  %v805_v21 = vsub.f32 %v803_v42, %v1317_v52  ;;  %v822_v0 = vsub.f32 %v1557_v34, %v1317_v52  ;;  %v1559_v9 = vand.u32 2147483647, %v1302_v63 }
 0x251   :  { %748 = vst [vmem:[#allocation5 + $0x68] sm:$0xff] %v745_v11  ;;  %765 = vst [vmem:[#allocation5 + $0x78] sm:$0xff] %v762_v28  ;;  %v839_v3 = vsub.f32 %v1558_v2, %v1317_v52  ;;  %v1560_v15 = vand.u32 2147483647, %v1304_v35  ;;  %v1561_v39 = vand.u32 2147483647, %v1306_v4 }
 0x252   :  { %v856_v10 = vsub.f32 %v1559_v9, %v1317_v52  ;;  %v773_v50 = vmax.f32 %v771_v59, 0.0  ;;  %v790_v18 = vmax.f32 %v788_v49, 0.0  ;;  %v807_v45 = vmax.f32 %v805_v21, 0.0 }
 0x253   :  { %v873_v29 = vsub.f32 %v1560_v15, %v1317_v52  ;;  %v890_v42 = vsub.f32 %v1561_v39, %v1317_v52  ;;  %v824_v20 = vmax.f32 %v822_v0, 0.0  ;;  %v841_v48 = vmax.f32 %v839_v3, 0.0 }
 0x254   :  { %v858_v24 = vmax.f32 %v856_v10, 0.0  ;;  %v777_v41 = vsub.f32 0.0, %v773_v50  ;;  %v794_v22 = vsub.f32 0.0, %v790_v18  ;;  %v811_v47 = vsub.f32 0.0, %v807_v45 }
 0x255   :  { %v875_v25 = vmax.f32 %v873_v29, 0.0  ;;  %v892_v38 = vmax.f32 %v890_v42, 0.0  ;;  %v828_v56 = vsub.f32 0.0, %v824_v20  ;;  %v845_v5 = vsub.f32 0.0, %v841_v48 }
 0x256   :  { %v862_v53 = vsub.f32 0.0, %v858_v24  ;;  %v779_v52 = vsel %vm775_vm9, %v773_v50, %v777_v41  ;;  %v796_v51 = vsel %vm792_vm10, %v790_v18, %v794_v22  ;;  %v813_v23 = vsel %vm809_vm11, %v807_v45, %v811_v47 }
 0x257   :  { %v879_v40 = vsub.f32 0.0, %v875_v25  ;;  %v896_v30 = vsub.f32 0.0, %v892_v38  ;;  %v830_v44 = vsel %vm826_vm12, %v824_v20, %v828_v56  ;;  %782 = vst [vmem:[#allocation5 + $0x88] sm:$0xff] %v779_v52  ;;  %799 = vst [vmem:[#allocation5 + $0x98] sm:$0xff] %v796_v51  ;;  %v847_v13 = vsel %vm843_vm13, %v841_v48, %v845_v5 }
 0x258   :  { %816 = vst [vmem:[#allocation5 + $0xa8] sm:$0xff] %v813_v23  ;;  %833 = vst [vmem:[#allocation5 + $0xb8] sm:$0xff] %v830_v44  ;;  %v864_v6 = vsel %vm860_vm14, %v858_v24, %v862_v53 }
 0x259   :  { %v881_v58 = vsel %vm877_vm15, %v875_v25, %v879_v40  ;;  %v898_v1 = vsel %vm894_vm0, %v892_v38, %v896_v30  ;;  %850 = vst [vmem:[#allocation5 + $0xc8] sm:$0xff] %v847_v13  ;;  %867 = vst [vmem:[#allocation5 + $0xd8] sm:$0xff] %v864_v6 }
 0x25a   :  { %884 = vst [vmem:[#allocation5 + $0xe8] sm:$0xff] %v881_v58  ;;  %901 = vst [vmem:[#allocation5 + $0xf8] sm:$0xff] %v898_v1 }
 0x25b   :  { %974 = shalt.err (!%p971_p12)
}
 0x25c   :  { %s975_s9 = scalar_lea.hbm %s1509_s3, 4096 }
 0x25d   :  { %p976_p13 = scmp.ne.s32.totalorder %s1509_s3, %s975_s9  ;;  %p979_p0 = scmp.lt.u32.totalorder %s975_s9, %s1509_s3 }
 0x25f   :  { %p981_p1 = pnand %p979_p0, %p976_p13 }
 0x261   :  { %984 = shalt.err (!%p981_p1)
}
 0x262   :  { %913 = dma.vmem_to_hbm [thread:$0]  %s908_s5, 4096, %s1509_s3, [#allocation4], %s990_s22, %s990_s22, %s991_s23  }
 0x263   :  { %987 = dma.done.wait [#allocation4], 4096  }
 0x264   :  { %988 = vsyncadd [#allocation4], 4294963200 }
 0x265   :  { %917 = vsyncpa [#allocation3], 1 }
 0x266   :  { %918 = vsyncpa [#allocation4], 1 }

</bundles_post_ra>
